<compile_context>
chip_gen: v7x
topology: tpu7x:2x2x1
jax: 0.10.0
libtpu: 0.0.40
codegen_flags: <defaults>
</compile_context>

<pallas_src>
import math

import numpy as np

import jax
import jax.numpy as jnp
from jax import lax
from jax.experimental import pallas as pl
from jax.experimental.pallas import tpu as pltpu

WIN_SSIM = 11          # SSIM gaussian window (sigma = 1.5)
WIN_AVG = 7            # avg_pool2d window used by Sharpness
C1 = 0.01 ** 2
C2 = 0.03 ** 2


# --------------------------------- kernel -----------------------------------

def _eval_recon_kernel(r_ref, t_ref, gw_ref, gh_ref, bw_ref, bh_ref, icnt_t_ref,
                       out_ref):
    f32 = jnp.float32
    P, H, W = r_ref.shape
    r = r_ref[...].astype(f32)
    t = t_ref[...].astype(f32)
    gw = gw_ref[...]
    gh = gh_ref[...]
    bw = bw_ref[...]
    bh = bh_ref[...]
    icnt_t = icnt_t_ref[...]                     # (W, H) transposed 1/valid-count

    def transpose_planes(x):
        # (B, H, W) -> (B, W, H) via per-plane 2-D transposes (XLU); B is static.
        return jnp.stack([x[i].T for i in range(x.shape[0])], axis=0)

    def sep_conv_t(x, wmat, hmat):
        # zero-padded "same" separable conv of every plane, returned TRANSPOSED:
        #   out[b] = (hmat @ (x[b] @ wmat))^T   (hmat symmetric -> right-matmul).
        # Both passes are single fused MXU matmuls over all stacked planes.
        b = x.shape[0]
        y = jnp.dot(x.reshape(b * H, W), wmat, preferred_element_type=f32)
        yt = transpose_planes(y.reshape(b, H, W))             # (b, W, H)
        z = jnp.dot(yt.reshape(b * W, H), hmat, preferred_element_type=f32)
        return z.reshape(b, W, H)

    # ------------------------------- MSE ------------------------------------
    diff = r - t
    sq_sum = jnp.sum(diff * diff)

    # -------------------- fused gaussian filtering (SSIM) --------------------
    rt = jnp.concatenate([r, t], axis=0)                       # (2P, H, W)
    stack5 = jnp.concatenate([rt, r * r, t * t, r * t], axis=0)  # (5P, H, W)
    g5 = sep_conv_t(stack5, gw, gh)                            # (5P, W, H) transposed

    mu1, mu2 = g5[0:P], g5[P:2 * P]
    e11, e22, e12 = g5[2 * P:3 * P], g5[3 * P:4 * P], g5[4 * P:5 * P]
    mu1_sq = mu1 * mu1
    mu2_sq = mu2 * mu2
    mu1_mu2 = mu1 * mu2
    sigma1_sq = e11 - mu1_sq
    sigma2_sq = e22 - mu2_sq
    sigma12 = e12 - mu1_mu2
    num = (2.0 * mu1_mu2 + C1) * (2.0 * sigma12 + C2)
    den = (mu1_sq + mu2_sq + C1) * (sigma1_sq + sigma2_sq + C2)
    ssim_sum = jnp.sum(num * pl.reciprocal(den, approx=True))

    # ------------------------------ Sharpness --------------------------------
    # avg_pool2d(x, 7, 1, 3, count_include_pad=False) + 1e-8, in transposed space.
    box2 = sep_conv_t(rt, bw, bh)                              # (2P, W, H)
    mu = box2 * icnt_t[None, :, :] + 1e-8
    inv_mu = pl.reciprocal(mu, approx=True)

    xT = transpose_planes(rt)                                  # (2P, W, H)
    x2 = xT.reshape(2 * P * W, H)
    rows = lax.broadcasted_iota(jnp.int32, (2 * P * W, H), 0)
    cols = lax.broadcasted_iota(jnp.int32, (2 * P * W, H), 1)
    # torch gradient = x - zero-filled shift.  The original W-diff is a sublane
    # shift here (cross-plane wraparound rows are exactly the masked w==0 rows);
    # the original H-diff is a lane shift.
    dx = x2 - jnp.where(rows % W == 0, 0.0, pltpu.roll(x2, 1, axis=0))
    dy = x2 - jnp.where(cols == 0, 0.0, pltpu.roll(x2, 1, axis=1))
    dx = dx.reshape(2 * P, W, H)
    dy = dy.reshape(2 * P, W, H)
    xm = xT - mu
    sharp = -(dx * dx + dy * dy) - jnp.abs(xm * inv_mu) - xm * xm
    sharp_sum = jnp.sum(jnp.abs(sharp[:P] - sharp[P:]))

    # --------------- one lane-dense partial-sum store per step ---------------
    lane = lax.broadcasted_iota(jnp.int32, (1, 128), 1)
    out_ref[0] = (jnp.where(lane == 0, ssim_sum, 0.0)
                  + jnp.where(lane == 1, sq_sum, 0.0)
                  + jnp.where(lane == 2, sharp_sum, 0.0)).astype(jnp.float32)


# ----------------------- host-side constant builders -------------------------

def _gauss_taps(size, sigma):
    xs = np.arange(size, dtype=np.float64) - size // 2
    g = np.exp(-(xs ** 2) / (2.0 * sigma ** 2))
    return (g / g.sum()).astype(np.float32)


def _band_matrix(n, taps):
    """m[a, b] = taps[b - a + p] for |b - a| <= p (symmetric taps -> symmetric m)."""
    taps = np.asarray(taps, np.float32)
    p = (len(taps) - 1) // 2
    idx = np.arange(n)
    off = idx[None, :] - idx[:, None]            # off[a, b] = b - a
    m = np.zeros((n, n), np.float32)
    mask = np.abs(off) <= p
    m[mask] = taps[(off + p)[mask]]
    return m


def _inv_count_t(h, w, win):
    """Transposed (W, H) map of 1/valid-count for count_include_pad=False pooling."""
    p = win // 2

    def counts(n):
        i = np.arange(n)
        return (np.minimum(i + p, n - 1) - np.maximum(i - p, 0) + 1).astype(np.float32)

    return (1.0 / np.outer(counts(w), counts(h))).astype(np.float32)


# ------------------------------ VMEM planning --------------------------------

def _vmem_cap_bytes():
    try:
        return int(pltpu.get_tpu_info().vmem_capacity_bytes)
    except Exception:
        return 64 * (1 << 20)        # v7x-safe fallback


def _vmem_estimate(p, h, w, in_itemsize):
    img = p * h * w
    return int(40 * 4 * img                              # live f32 intermediate maps
               + 2 * 2 * img * in_itemsize               # double-buffered input blocks
               + 2 * 4 * (2 * w * w + 2 * h * h + w * h)  # banded conv constants
               + (4 << 20))                              # headroom / output / misc


# --------------------------------- wrapper -----------------------------------

def eval_recon(recon, target):
    """JAX/Pallas equivalent of EvalRecon.forward -> (psnr, ssim, mse, sharp)."""
    B, C, H, W = recon.shape
    N = B * C
    r = recon.reshape(N, H, W)      # native dtype; upcast happens in-kernel
    t = target.reshape(N, H, W)

    cap = _vmem_cap_bytes()
    in_itemsize = np.dtype(recon.dtype).itemsize
    # planes per grid step: largest divisor of N (<= 8) whose footprint fits VMEM.
    P = 1
    for d in range(1, min(N, 8) + 1):
        if N % d == 0 and _vmem_estimate(d, H, W, in_itemsize) <= int(0.8 * cap):
            P = d
    G = N // P
    vmem_limit = int(min(max(_vmem_estimate(P, H, W, in_itemsize), 32 << 20),
                         int(0.875 * cap)))
    # TODO(synk): for very large planes (single-plane f32 maps no longer fitting
    # VMEM, esp. v7x's 64 MiB) additionally tile H with an 11-row halo and
    # block-band the gw/gh/bw/bh contractions instead of dense (W,W)/(H,H) matmuls.

    g = _gauss_taps(WIN_SSIM, 1.5)
    gw = jnp.asarray(_band_matrix(W, g))
    gh = jnp.asarray(_band_matrix(H, g))
    box = np.ones(WIN_AVG, np.float32)
    bw = jnp.asarray(_band_matrix(W, box))
    bh = jnp.asarray(_band_matrix(H, box))
    icnt_t = jnp.asarray(_inv_count_t(H, W, WIN_AVG))

    img_spec = pl.BlockSpec((P, H, W), lambda i: (i, 0, 0))
    wmat_spec = pl.BlockSpec((W, W), lambda i: (0, 0))
    hmat_spec = pl.BlockSpec((H, H), lambda i: (0, 0))
    wh_spec = pl.BlockSpec((W, H), lambda i: (0, 0))
    out_spec = pl.BlockSpec((1, 1, 128), lambda i: (i, 0, 0))

    partial = pl.pallas_call(
        _eval_recon_kernel,
        grid=(G,),
        in_specs=[img_spec, img_spec, wmat_spec, hmat_spec, wmat_spec, hmat_spec,
                  wh_spec],
        out_specs=out_spec,
        out_shape=jax.ShapeDtypeStruct((G, 1, 128), jnp.float32),
        compiler_params=pltpu.CompilerParams(
            dimension_semantics=("parallel",),
            vmem_limit_bytes=vmem_limit),
    )(r, t, gw, gh, bw, bh, icnt_t)

    sums = jnp.sum(partial, axis=(0, 1))            # (128,): lanes 0..2 are the sums
    n_elem = float(N * H * W)
    ssim = sums[0] / n_elem
    mse = sums[1] / n_elem
    sharp = sums[2] / n_elem
    psnr = -10.0 * jnp.log(mse) / math.log(10.0)
    return psnr, ssim, mse, sharp


if __name__ == "__main__":
    key = jax.random.PRNGKey(0)
    k1, k2 = jax.random.split(key)
    B, C, H, W = 2, 1, 16, 16
    recon = jax.random.uniform(k1, (B, C, H, W), dtype=jnp.float32)
    target = jax.random.uniform(k2, (B, C, H, W), dtype=jnp.float32)

    outs = jax.block_until_ready(jax.jit(eval_recon)(recon, target))
    # mimic .item(): host-side python floats
    psnr_v, ssim_v, mse_v, sharp_v = (float(o) for o in outs)
    assert all(math.isfinite(v) for v in (psnr_v, ssim_v, mse_v, sharp_v))
    print("KERNEL_OK")
</pallas_src>

<mosaic_0001>
module attributes {stable_mosaic.version = 11 : i64} {
  func.func @_eval_recon_kernel(%arg0: i32, %arg1: memref<2x16x16xf32, #tpu.memory_space<vmem>>, %arg2: memref<2x16x16xf32, #tpu.memory_space<vmem>>, %arg3: memref<16x16xf32, #tpu.memory_space<vmem>>, %arg4: memref<16x16xf32, #tpu.memory_space<vmem>>, %arg5: memref<16x16xf32, #tpu.memory_space<vmem>>, %arg6: memref<16x16xf32, #tpu.memory_space<vmem>>, %arg7: memref<16x16xf32, #tpu.memory_space<vmem>>, %arg8: memref<1x1x128xf32, #tpu.memory_space<vmem>>) attributes {dimension_semantics = [#tpu.dimension_semantics<parallel>], iteration_bounds = array<i64: 1>, scalar_prefetch = 0 : i64, scratch_operands = 0 : i64, tpu.core_type = #tpu.core_type<tc>, window_params = [{transform_indices = @transform_0, window_bounds = array<i64: 2, 16, 16>}, {transform_indices = @transform_1, window_bounds = array<i64: 2, 16, 16>}, {pipeline_mode = #tpu.pipeline_mode<synchronous>, transform_indices = @transform_2, window_bounds = array<i64: 16, 16>}, {pipeline_mode = #tpu.pipeline_mode<synchronous>, transform_indices = @transform_3, window_bounds = array<i64: 16, 16>}, {pipeline_mode = #tpu.pipeline_mode<synchronous>, transform_indices = @transform_4, window_bounds = array<i64: 16, 16>}, {pipeline_mode = #tpu.pipeline_mode<synchronous>, transform_indices = @transform_5, window_bounds = array<i64: 16, 16>}, {pipeline_mode = #tpu.pipeline_mode<synchronous>, transform_indices = @transform_6, window_bounds = array<i64: 16, 16>}, {transform_indices = @transform_7, window_bounds = array<i64: 1, 1, 128>}]} {
    %c0 = arith.constant 0 : index
    %c0_0 = arith.constant 0 : index
    %c0_1 = arith.constant 0 : index
    %0 = vector.load %arg1[%c0, %c0_0, %c0_1] : memref<2x16x16xf32, #tpu.memory_space<vmem>>, vector<2x16x16xf32>
    %c0_2 = arith.constant 0 : index
    %c0_3 = arith.constant 0 : index
    %c0_4 = arith.constant 0 : index
    %1 = vector.load %arg2[%c0_2, %c0_3, %c0_4] : memref<2x16x16xf32, #tpu.memory_space<vmem>>, vector<2x16x16xf32>
    %c0_5 = arith.constant 0 : index
    %c0_6 = arith.constant 0 : index
    %2 = vector.load %arg3[%c0_5, %c0_6] : memref<16x16xf32, #tpu.memory_space<vmem>>, vector<16x16xf32>
    %c0_7 = arith.constant 0 : index
    %c0_8 = arith.constant 0 : index
    %3 = vector.load %arg4[%c0_7, %c0_8] : memref<16x16xf32, #tpu.memory_space<vmem>>, vector<16x16xf32>
    %c0_9 = arith.constant 0 : index
    %c0_10 = arith.constant 0 : index
    %4 = vector.load %arg5[%c0_9, %c0_10] : memref<16x16xf32, #tpu.memory_space<vmem>>, vector<16x16xf32>
    %c0_11 = arith.constant 0 : index
    %c0_12 = arith.constant 0 : index
    %5 = vector.load %arg6[%c0_11, %c0_12] : memref<16x16xf32, #tpu.memory_space<vmem>>, vector<16x16xf32>
    %c0_13 = arith.constant 0 : index
    %c0_14 = arith.constant 0 : index
    %6 = vector.load %arg7[%c0_13, %c0_14] : memref<16x16xf32, #tpu.memory_space<vmem>>, vector<16x16xf32>
    %7 = arith.subf %0, %1 : vector<2x16x16xf32>
    %8 = arith.mulf %7, %7 : vector<2x16x16xf32>
    %9 = vector.shape_cast %8 : vector<2x16x16xf32> to vector<1x2x16x16xf32>
    %cst = arith.constant dense<0.000000e+00> : vector<1xf32>
    %10 = vector.multi_reduction <add>, %9, %cst [1, 2, 3] : vector<1x2x16x16xf32> to vector<1xf32>
    %11 = vector.shape_cast %10 : vector<1xf32> to vector<1x1x1x1xf32>
    %12 = vector.extract %11[0, 0, 0, 0] : f32 from vector<1x1x1x1xf32>
    %13 = tpu.concatenate %0, %1 in 0 : vector<2x16x16xf32>, vector<2x16x16xf32> -> vector<4x16x16xf32>
    %14 = arith.mulf %0, %0 : vector<2x16x16xf32>
    %15 = arith.mulf %1, %1 : vector<2x16x16xf32>
    %16 = arith.mulf %0, %1 : vector<2x16x16xf32>
    %17 = tpu.concatenate %13, %14, %15, %16 in 0 : vector<4x16x16xf32>, vector<2x16x16xf32>, vector<2x16x16xf32>, vector<2x16x16xf32> -> vector<10x16x16xf32>
    %18 = vector.shape_cast %17 : vector<10x16x16xf32> to vector<160x16xf32>
    %cst_15 = arith.constant dense<0.000000e+00> : vector<160x16xf32>
    %19 = tpu.matmul %18, %2, %cst_15 {dimension_numbers = #tpu.dot_dimension_numbers<[1], [0], [0], [1], [0, 0, 1, 1], [], []>} : vector<160x16xf32>, vector<16x16xf32>, vector<160x16xf32> -> vector<160x16xf32>
    %20 = vector.shape_cast %19 : vector<160x16xf32> to vector<10x16x16xf32>
    %21 = vector.extract_strided_slice %20 {offsets = [0, 0, 0], sizes = [1, 16, 16], strides = [1, 1, 1]} : vector<10x16x16xf32> to vector<1x16x16xf32>
    %22 = vector.shape_cast %21 : vector<1x16x16xf32> to vector<16x16xf32>
    %23 = tpu.transpose %22, [1, 0] : vector<16x16xf32> -> vector<16x16xf32>
    %24 = vector.extract_strided_slice %20 {offsets = [1, 0, 0], sizes = [1, 16, 16], strides = [1, 1, 1]} : vector<10x16x16xf32> to vector<1x16x16xf32>
    %25 = vector.shape_cast %24 : vector<1x16x16xf32> to vector<16x16xf32>
    %26 = tpu.transpose %25, [1, 0] : vector<16x16xf32> -> vector<16x16xf32>
    %27 = vector.extract_strided_slice %20 {offsets = [2, 0, 0], sizes = [1, 16, 16], strides = [1, 1, 1]} : vector<10x16x16xf32> to vector<1x16x16xf32>
    %28 = vector.shape_cast %27 : vector<1x16x16xf32> to vector<16x16xf32>
    %29 = tpu.transpose %28, [1, 0] : vector<16x16xf32> -> vector<16x16xf32>
    %30 = vector.extract_strided_slice %20 {offsets = [3, 0, 0], sizes = [1, 16, 16], strides = [1, 1, 1]} : vector<10x16x16xf32> to vector<1x16x16xf32>
    %31 = vector.shape_cast %30 : vector<1x16x16xf32> to vector<16x16xf32>
    %32 = tpu.transpose %31, [1, 0] : vector<16x16xf32> -> vector<16x16xf32>
    %33 = vector.extract_strided_slice %20 {offsets = [4, 0, 0], sizes = [1, 16, 16], strides = [1, 1, 1]} : vector<10x16x16xf32> to vector<1x16x16xf32>
    %34 = vector.shape_cast %33 : vector<1x16x16xf32> to vector<16x16xf32>
    %35 = tpu.transpose %34, [1, 0] : vector<16x16xf32> -> vector<16x16xf32>
    %36 = vector.extract_strided_slice %20 {offsets = [5, 0, 0], sizes = [1, 16, 16], strides = [1, 1, 1]} : vector<10x16x16xf32> to vector<1x16x16xf32>
    %37 = vector.shape_cast %36 : vector<1x16x16xf32> to vector<16x16xf32>
    %38 = tpu.transpose %37, [1, 0] : vector<16x16xf32> -> vector<16x16xf32>
    %39 = vector.extract_strided_slice %20 {offsets = [6, 0, 0], sizes = [1, 16, 16], strides = [1, 1, 1]} : vector<10x16x16xf32> to vector<1x16x16xf32>
    %40 = vector.shape_cast %39 : vector<1x16x16xf32> to vector<16x16xf32>
    %41 = tpu.transpose %40, [1, 0] : vector<16x16xf32> -> vector<16x16xf32>
    %42 = vector.extract_strided_slice %20 {offsets = [7, 0, 0], sizes = [1, 16, 16], strides = [1, 1, 1]} : vector<10x16x16xf32> to vector<1x16x16xf32>
    %43 = vector.shape_cast %42 : vector<1x16x16xf32> to vector<16x16xf32>
    %44 = tpu.transpose %43, [1, 0] : vector<16x16xf32> -> vector<16x16xf32>
    %45 = vector.extract_strided_slice %20 {offsets = [8, 0, 0], sizes = [1, 16, 16], strides = [1, 1, 1]} : vector<10x16x16xf32> to vector<1x16x16xf32>
    %46 = vector.shape_cast %45 : vector<1x16x16xf32> to vector<16x16xf32>
    %47 = tpu.transpose %46, [1, 0] : vector<16x16xf32> -> vector<16x16xf32>
    %48 = vector.extract_strided_slice %20 {offsets = [9, 0, 0], sizes = [1, 16, 16], strides = [1, 1, 1]} : vector<10x16x16xf32> to vector<1x16x16xf32>
    %49 = vector.shape_cast %48 : vector<1x16x16xf32> to vector<16x16xf32>
    %50 = tpu.transpose %49, [1, 0] : vector<16x16xf32> -> vector<16x16xf32>
    %51 = vector.shape_cast %23 : vector<16x16xf32> to vector<1x16x16xf32>
    %52 = vector.shape_cast %26 : vector<16x16xf32> to vector<1x16x16xf32>
    %53 = vector.shape_cast %29 : vector<16x16xf32> to vector<1x16x16xf32>
    %54 = vector.shape_cast %32 : vector<16x16xf32> to vector<1x16x16xf32>
    %55 = vector.shape_cast %35 : vector<16x16xf32> to vector<1x16x16xf32>
    %56 = vector.shape_cast %38 : vector<16x16xf32> to vector<1x16x16xf32>
    %57 = vector.shape_cast %41 : vector<16x16xf32> to vector<1x16x16xf32>
    %58 = vector.shape_cast %44 : vector<16x16xf32> to vector<1x16x16xf32>
    %59 = vector.shape_cast %47 : vector<16x16xf32> to vector<1x16x16xf32>
    %60 = vector.shape_cast %50 : vector<16x16xf32> to vector<1x16x16xf32>
    %61 = tpu.concatenate %51, %52, %53, %54, %55, %56, %57, %58, %59, %60 in 0 : vector<1x16x16xf32>, vector<1x16x16xf32>, vector<1x16x16xf32>, vector<1x16x16xf32>, vector<1x16x16xf32>, vector<1x16x16xf32>, vector<1x16x16xf32>, vector<1x16x16xf32>, vector<1x16x16xf32>, vector<1x16x16xf32> -> vector<10x16x16xf32>
    %62 = vector.shape_cast %61 : vector<10x16x16xf32> to vector<160x16xf32>
    %cst_16 = arith.constant dense<0.000000e+00> : vector<160x16xf32>
    %63 = tpu.matmul %62, %3, %cst_16 {dimension_numbers = #tpu.dot_dimension_numbers<[1], [0], [0], [1], [0, 0, 1, 1], [], []>} : vector<160x16xf32>, vector<16x16xf32>, vector<160x16xf32> -> vector<160x16xf32>
    %64 = vector.shape_cast %63 : vector<160x16xf32> to vector<10x16x16xf32>
    %65 = vector.extract_strided_slice %64 {offsets = [0, 0, 0], sizes = [2, 16, 16], strides = [1, 1, 1]} : vector<10x16x16xf32> to vector<2x16x16xf32>
    %66 = vector.extract_strided_slice %64 {offsets = [2, 0, 0], sizes = [2, 16, 16], strides = [1, 1, 1]} : vector<10x16x16xf32> to vector<2x16x16xf32>
    %67 = vector.extract_strided_slice %64 {offsets = [4, 0, 0], sizes = [2, 16, 16], strides = [1, 1, 1]} : vector<10x16x16xf32> to vector<2x16x16xf32>
    %68 = vector.extract_strided_slice %64 {offsets = [6, 0, 0], sizes = [2, 16, 16], strides = [1, 1, 1]} : vector<10x16x16xf32> to vector<2x16x16xf32>
    %69 = vector.extract_strided_slice %64 {offsets = [8, 0, 0], sizes = [2, 16, 16], strides = [1, 1, 1]} : vector<10x16x16xf32> to vector<2x16x16xf32>
    %70 = arith.mulf %65, %65 : vector<2x16x16xf32>
    %71 = arith.mulf %66, %66 : vector<2x16x16xf32>
    %72 = arith.mulf %65, %66 : vector<2x16x16xf32>
    %73 = arith.subf %67, %70 : vector<2x16x16xf32>
    %74 = arith.subf %68, %71 : vector<2x16x16xf32>
    %75 = arith.subf %69, %72 : vector<2x16x16xf32>
    %cst_17 = arith.constant 2.000000e+00 : f32
    %76 = vector.broadcast %cst_17 : f32 to vector<2x16x16xf32>
    %77 = arith.mulf %76, %72 : vector<2x16x16xf32>
    %cst_18 = arith.constant 9.99999974E-5 : f32
    %78 = vector.broadcast %cst_18 : f32 to vector<2x16x16xf32>
    %79 = arith.addf %77, %78 : vector<2x16x16xf32>
    %cst_19 = arith.constant 2.000000e+00 : f32
    %80 = vector.broadcast %cst_19 : f32 to vector<2x16x16xf32>
    %81 = arith.mulf %80, %75 : vector<2x16x16xf32>
    %cst_20 = arith.constant 8.99999984E-4 : f32
    %82 = vector.broadcast %cst_20 : f32 to vector<2x16x16xf32>
    %83 = arith.addf %81, %82 : vector<2x16x16xf32>
    %84 = arith.mulf %79, %83 : vector<2x16x16xf32>
    %85 = arith.addf %70, %71 : vector<2x16x16xf32>
    %cst_21 = arith.constant 9.99999974E-5 : f32
    %86 = vector.broadcast %cst_21 : f32 to vector<2x16x16xf32>
    %87 = arith.addf %85, %86 : vector<2x16x16xf32>
    %88 = arith.addf %73, %74 : vector<2x16x16xf32>
    %cst_22 = arith.constant 8.99999984E-4 : f32
    %89 = vector.broadcast %cst_22 : f32 to vector<2x16x16xf32>
    %90 = arith.addf %88, %89 : vector<2x16x16xf32>
    %91 = arith.mulf %87, %90 : vector<2x16x16xf32>
    %92 = tpu.reciprocal %91 {approx = true} : vector<2x16x16xf32> -> vector<2x16x16xf32>
    %93 = arith.mulf %84, %92 : vector<2x16x16xf32>
    %94 = vector.shape_cast %93 : vector<2x16x16xf32> to vector<1x2x16x16xf32>
    %cst_23 = arith.constant dense<0.000000e+00> : vector<1xf32>
    %95 = vector.multi_reduction <add>, %94, %cst_23 [1, 2, 3] : vector<1x2x16x16xf32> to vector<1xf32>
    %96 = vector.shape_cast %95 : vector<1xf32> to vector<1x1x1x1xf32>
    %97 = vector.extract %96[0, 0, 0, 0] : f32 from vector<1x1x1x1xf32>
    %98 = vector.shape_cast %13 : vector<4x16x16xf32> to vector<64x16xf32>
    %cst_24 = arith.constant dense<0.000000e+00> : vector<64x16xf32>
    %99 = tpu.matmul %98, %4, %cst_24 {dimension_numbers = #tpu.dot_dimension_numbers<[1], [0], [0], [1], [0, 0, 1, 1], [], []>} : vector<64x16xf32>, vector<16x16xf32>, vector<64x16xf32> -> vector<64x16xf32>
    %100 = vector.shape_cast %99 : vector<64x16xf32> to vector<4x16x16xf32>
    %101 = vector.extract_strided_slice %100 {offsets = [0, 0, 0], sizes = [1, 16, 16], strides = [1, 1, 1]} : vector<4x16x16xf32> to vector<1x16x16xf32>
    %102 = vector.shape_cast %101 : vector<1x16x16xf32> to vector<16x16xf32>
    %103 = tpu.transpose %102, [1, 0] : vector<16x16xf32> -> vector<16x16xf32>
    %104 = vector.extract_strided_slice %100 {offsets = [1, 0, 0], sizes = [1, 16, 16], strides = [1, 1, 1]} : vector<4x16x16xf32> to vector<1x16x16xf32>
    %105 = vector.shape_cast %104 : vector<1x16x16xf32> to vector<16x16xf32>
    %106 = tpu.transpose %105, [1, 0] : vector<16x16xf32> -> vector<16x16xf32>
    %107 = vector.extract_strided_slice %100 {offsets = [2, 0, 0], sizes = [1, 16, 16], strides = [1, 1, 1]} : vector<4x16x16xf32> to vector<1x16x16xf32>
    %108 = vector.shape_cast %107 : vector<1x16x16xf32> to vector<16x16xf32>
    %109 = tpu.transpose %108, [1, 0] : vector<16x16xf32> -> vector<16x16xf32>
    %110 = vector.extract_strided_slice %100 {offsets = [3, 0, 0], sizes = [1, 16, 16], strides = [1, 1, 1]} : vector<4x16x16xf32> to vector<1x16x16xf32>
    %111 = vector.shape_cast %110 : vector<1x16x16xf32> to vector<16x16xf32>
    %112 = tpu.transpose %111, [1, 0] : vector<16x16xf32> -> vector<16x16xf32>
    %113 = vector.shape_cast %103 : vector<16x16xf32> to vector<1x16x16xf32>
    %114 = vector.shape_cast %106 : vector<16x16xf32> to vector<1x16x16xf32>
    %115 = vector.shape_cast %109 : vector<16x16xf32> to vector<1x16x16xf32>
    %116 = vector.shape_cast %112 : vector<16x16xf32> to vector<1x16x16xf32>
    %117 = tpu.concatenate %113, %114, %115, %116 in 0 : vector<1x16x16xf32>, vector<1x16x16xf32>, vector<1x16x16xf32>, vector<1x16x16xf32> -> vector<4x16x16xf32>
    %118 = vector.shape_cast %117 : vector<4x16x16xf32> to vector<64x16xf32>
    %cst_25 = arith.constant dense<0.000000e+00> : vector<64x16xf32>
    %119 = tpu.matmul %118, %5, %cst_25 {dimension_numbers = #tpu.dot_dimension_numbers<[1], [0], [0], [1], [0, 0, 1, 1], [], []>} : vector<64x16xf32>, vector<16x16xf32>, vector<64x16xf32> -> vector<64x16xf32>
    %120 = vector.shape_cast %119 : vector<64x16xf32> to vector<4x16x16xf32>
    %121 = vector.shape_cast %6 : vector<16x16xf32> to vector<1x16x16xf32>
    %122 = vector.broadcast %121 : vector<1x16x16xf32> to vector<4x16x16xf32>
    %123 = arith.mulf %120, %122 : vector<4x16x16xf32>
    %cst_26 = arith.constant 9.99999993E-9 : f32
    %124 = vector.broadcast %cst_26 : f32 to vector<4x16x16xf32>
    %125 = arith.addf %123, %124 : vector<4x16x16xf32>
    %126 = tpu.reciprocal %125 {approx = true} : vector<4x16x16xf32> -> vector<4x16x16xf32>
    %127 = vector.extract_strided_slice %13 {offsets = [0, 0, 0], sizes = [1, 16, 16], strides = [1, 1, 1]} : vector<4x16x16xf32> to vector<1x16x16xf32>
    %128 = vector.shape_cast %127 : vector<1x16x16xf32> to vector<16x16xf32>
    %129 = tpu.transpose %128, [1, 0] : vector<16x16xf32> -> vector<16x16xf32>
    %130 = vector.extract_strided_slice %13 {offsets = [1, 0, 0], sizes = [1, 16, 16], strides = [1, 1, 1]} : vector<4x16x16xf32> to vector<1x16x16xf32>
    %131 = vector.shape_cast %130 : vector<1x16x16xf32> to vector<16x16xf32>
    %132 = tpu.transpose %131, [1, 0] : vector<16x16xf32> -> vector<16x16xf32>
    %133 = vector.extract_strided_slice %13 {offsets = [2, 0, 0], sizes = [1, 16, 16], strides = [1, 1, 1]} : vector<4x16x16xf32> to vector<1x16x16xf32>
    %134 = vector.shape_cast %133 : vector<1x16x16xf32> to vector<16x16xf32>
    %135 = tpu.transpose %134, [1, 0] : vector<16x16xf32> -> vector<16x16xf32>
    %136 = vector.extract_strided_slice %13 {offsets = [3, 0, 0], sizes = [1, 16, 16], strides = [1, 1, 1]} : vector<4x16x16xf32> to vector<1x16x16xf32>
    %137 = vector.shape_cast %136 : vector<1x16x16xf32> to vector<16x16xf32>
    %138 = tpu.transpose %137, [1, 0] : vector<16x16xf32> -> vector<16x16xf32>
    %139 = vector.shape_cast %129 : vector<16x16xf32> to vector<1x16x16xf32>
    %140 = vector.shape_cast %132 : vector<16x16xf32> to vector<1x16x16xf32>
    %141 = vector.shape_cast %135 : vector<16x16xf32> to vector<1x16x16xf32>
    %142 = vector.shape_cast %138 : vector<16x16xf32> to vector<1x16x16xf32>
    %143 = tpu.concatenate %139, %140, %141, %142 in 0 : vector<1x16x16xf32>, vector<1x16x16xf32>, vector<1x16x16xf32>, vector<1x16x16xf32> -> vector<4x16x16xf32>
    %144 = vector.shape_cast %143 : vector<4x16x16xf32> to vector<64x16xf32>
    %145 = tpu.iota {dimensions = array<i32: 0>} : vector<64x16xi32>
    %146 = tpu.iota {dimensions = array<i32: 1>} : vector<64x16xi32>
    %c16_i32 = arith.constant 16 : i32
    %c0_i32 = arith.constant 0 : i32
    %147 = arith.cmpi eq, %c16_i32, %c0_i32 : i32
    %c1_i32 = arith.constant 1 : i32
    %148 = arith.select %147, %c1_i32, %c16_i32 : i32
    %149 = vector.broadcast %148 : i32 to vector<64x16xi32>
    %150 = arith.remsi %145, %149 : vector<64x16xi32>
    %c0_i32_27 = arith.constant 0 : i32
    %151 = vector.broadcast %c0_i32_27 : i32 to vector<64x16xi32>
    %152 = arith.cmpi ne, %150, %151 : vector<64x16xi32>
    %c0_i32_28 = arith.constant 0 : i32
    %153 = vector.broadcast %c0_i32_28 : i32 to vector<64x16xi32>
    %154 = arith.cmpi slt, %150, %153 : vector<64x16xi32>
    %c0_i32_29 = arith.constant 0 : i32
    %155 = arith.cmpi slt, %148, %c0_i32_29 : i32
    %156 = vector.broadcast %155 : i1 to vector<64x16xi1>
    %157 = vector.broadcast %156 : vector<64x16xi1> to vector<64x16xi1>
    %158 = arith.xori %154, %157 : vector<64x16xi1>
    %159 = arith.andi %158, %152 : vector<64x16xi1>
    %160 = vector.broadcast %148 : i32 to vector<64x16xi32>
    %161 = arith.addi %150, %160 : vector<64x16xi32>
    %162 = arith.select %159, %161, %150 : vector<64x16xi1>, vector<64x16xi32>
    %c0_i32_30 = arith.constant 0 : i32
    %163 = vector.broadcast %c0_i32_30 : i32 to vector<64x16xi32>
    %164 = arith.cmpi eq, %162, %163 : vector<64x16xi32>
    %c1_i32_31 = arith.constant 1 : i32
    %165 = tpu.dynamic_rotate %144 by %c1_i32_31 dim 0 : vector<64x16xf32>, i32 -> vector<64x16xf32>
    %cst_32 = arith.constant 0.000000e+00 : f32
    %166 = vector.broadcast %cst_32 : f32 to vector<64x16xf32>
    %167 = arith.select %164, %166, %165 : vector<64x16xi1>, vector<64x16xf32>
    %168 = arith.subf %144, %167 : vector<64x16xf32>
    %c0_i32_33 = arith.constant 0 : i32
    %169 = vector.broadcast %c0_i32_33 : i32 to vector<64x16xi32>
    %170 = arith.cmpi eq, %146, %169 : vector<64x16xi32>
    %c1_i32_34 = arith.constant 1 : i32
    %171 = tpu.dynamic_rotate %144 by %c1_i32_34 dim 1 : vector<64x16xf32>, i32 -> vector<64x16xf32>
    %cst_35 = arith.constant 0.000000e+00 : f32
    %172 = vector.broadcast %cst_35 : f32 to vector<64x16xf32>
    %173 = arith.select %170, %172, %171 : vector<64x16xi1>, vector<64x16xf32>
    %174 = arith.subf %144, %173 : vector<64x16xf32>
    %175 = vector.shape_cast %168 : vector<64x16xf32> to vector<4x16x16xf32>
    %176 = vector.shape_cast %174 : vector<64x16xf32> to vector<4x16x16xf32>
    %177 = arith.subf %143, %125 : vector<4x16x16xf32>
    %178 = arith.mulf %175, %175 : vector<4x16x16xf32>
    %179 = arith.mulf %176, %176 : vector<4x16x16xf32>
    %180 = arith.addf %178, %179 : vector<4x16x16xf32>
    %cst_36 = arith.constant 0.000000e+00 : f32
    %181 = vector.broadcast %cst_36 : f32 to vector<4x16x16xf32>
    %182 = arith.subf %181, %180 : vector<4x16x16xf32>
    %183 = arith.mulf %177, %126 : vector<4x16x16xf32>
    %184 = math.absf %183 : vector<4x16x16xf32>
    %185 = arith.subf %182, %184 : vector<4x16x16xf32>
    %186 = arith.mulf %177, %177 : vector<4x16x16xf32>
    %187 = arith.subf %185, %186 : vector<4x16x16xf32>
    %188 = vector.extract_strided_slice %187 {offsets = [0, 0, 0], sizes = [2, 16, 16], strides = [1, 1, 1]} : vector<4x16x16xf32> to vector<2x16x16xf32>
    %189 = vector.extract_strided_slice %187 {offsets = [2, 0, 0], sizes = [2, 16, 16], strides = [1, 1, 1]} : vector<4x16x16xf32> to vector<2x16x16xf32>
    %190 = arith.subf %188, %189 : vector<2x16x16xf32>
    %191 = math.absf %190 : vector<2x16x16xf32>
    %192 = vector.shape_cast %191 : vector<2x16x16xf32> to vector<1x2x16x16xf32>
    %cst_37 = arith.constant dense<0.000000e+00> : vector<1xf32>
    %193 = vector.multi_reduction <add>, %192, %cst_37 [1, 2, 3] : vector<1x2x16x16xf32> to vector<1xf32>
    %194 = vector.shape_cast %193 : vector<1xf32> to vector<1x1x1x1xf32>
    %195 = vector.extract %194[0, 0, 0, 0] : f32 from vector<1x1x1x1xf32>
    %196 = tpu.iota {dimensions = array<i32: 1>} : vector<1x128xi32>
    %c0_i32_38 = arith.constant 0 : i32
    %197 = vector.broadcast %c0_i32_38 : i32 to vector<1x128xi32>
    %198 = arith.cmpi eq, %196, %197 : vector<1x128xi32>
    %cst_39 = arith.constant 0.000000e+00 : f32
    %199 = vector.broadcast %97 : f32 to vector<1x128xf32>
    %200 = vector.broadcast %cst_39 : f32 to vector<1x128xf32>
    %201 = arith.select %198, %199, %200 : vector<1x128xi1>, vector<1x128xf32>
    %c1_i32_40 = arith.constant 1 : i32
    %202 = vector.broadcast %c1_i32_40 : i32 to vector<1x128xi32>
    %203 = arith.cmpi eq, %196, %202 : vector<1x128xi32>
    %cst_41 = arith.constant 0.000000e+00 : f32
    %204 = vector.broadcast %12 : f32 to vector<1x128xf32>
    %205 = vector.broadcast %cst_41 : f32 to vector<1x128xf32>
    %206 = arith.select %203, %204, %205 : vector<1x128xi1>, vector<1x128xf32>
    %207 = arith.addf %201, %206 : vector<1x128xf32>
    %c2_i32 = arith.constant 2 : i32
    %208 = vector.broadcast %c2_i32 : i32 to vector<1x128xi32>
    %209 = arith.cmpi eq, %196, %208 : vector<1x128xi32>
    %cst_42 = arith.constant 0.000000e+00 : f32
    %210 = vector.broadcast %195 : f32 to vector<1x128xf32>
    %211 = vector.broadcast %cst_42 : f32 to vector<1x128xf32>
    %212 = arith.select %209, %210, %211 : vector<1x128xi1>, vector<1x128xf32>
    %213 = arith.addf %207, %212 : vector<1x128xf32>
    %c0_43 = arith.constant 0 : index
    %c0_44 = arith.constant 0 : index
    %c0_45 = arith.constant 0 : index
    %214 = vector.load %arg8[%c0_43, %c0_44, %c0_45] : memref<1x1x128xf32, #tpu.memory_space<vmem>>, vector<1x1x128xf32>
    %215 = vector.shape_cast %214 : vector<1x1x128xf32> to vector<1x128xf32>
    %216 = vector.shape_cast %213 : vector<1x128xf32> to vector<1x1x128xf32>
    tpu.vector_store %arg8[%c0_43, %c0_44, %c0_45], %216 {strides = array<i32>} : memref<1x1x128xf32, #tpu.memory_space<vmem>>, vector<1x1x128xf32>,
    return
  }
  func.func @transform_0(%arg0: i32) -> (i32, i32, i32) {
    %c0_i32 = arith.constant 0 : i32
    %c0_i32_0 = arith.constant 0 : i32
    %c0_i32_1 = arith.constant 0 : i32
    return %arg0, %c0_i32, %c0_i32_0 : i32, i32, i32
  }
  func.func @transform_1(%arg0: i32) -> (i32, i32, i32) {
    %c0_i32 = arith.constant 0 : i32
    %c0_i32_0 = arith.constant 0 : i32
    %c0_i32_1 = arith.constant 0 : i32
    return %arg0, %c0_i32, %c0_i32_0 : i32, i32, i32
  }
  func.func @transform_2(%arg0: i32) -> (i32, i32) {
    %c0_i32 = arith.constant 0 : i32
    %c0_i32_0 = arith.constant 0 : i32
    %c0_i32_1 = arith.constant 0 : i32
    return %c0_i32, %c0_i32_0 : i32, i32
  }
  func.func @transform_3(%arg0: i32) -> (i32, i32) {
    %c0_i32 = arith.constant 0 : i32
    %c0_i32_0 = arith.constant 0 : i32
    %c0_i32_1 = arith.constant 0 : i32
    return %c0_i32, %c0_i32_0 : i32, i32
  }
  func.func @transform_4(%arg0: i32) -> (i32, i32) {
    %c0_i32 = arith.constant 0 : i32
    %c0_i32_0 = arith.constant 0 : i32
    %c0_i32_1 = arith.constant 0 : i32
    return %c0_i32, %c0_i32_0 : i32, i32
  }
  func.func @transform_5(%arg0: i32) -> (i32, i32) {
    %c0_i32 = arith.constant 0 : i32
    %c0_i32_0 = arith.constant 0 : i32
    %c0_i32_1 = arith.constant 0 : i32
    return %c0_i32, %c0_i32_0 : i32, i32
  }
  func.func @transform_6(%arg0: i32) -> (i32, i32) {
    %c0_i32 = arith.constant 0 : i32
    %c0_i32_0 = arith.constant 0 : i32
    %c0_i32_1 = arith.constant 0 : i32
    return %c0_i32, %c0_i32_0 : i32, i32
  }
  func.func @transform_7(%arg0: i32) -> (i32, i32, i32) {
    %c0_i32 = arith.constant 0 : i32
    %c0_i32_0 = arith.constant 0 : i32
    %c0_i32_1 = arith.constant 0 : i32
    return %arg0, %c0_i32, %c0_i32_0 : i32, i32, i32
  }
}

</mosaic_0001>

<bundles_post_ra>
// kernel: eval_recon.1
= control target key start
LH: loop header
LB: loop body
LE: loop exit
PB: predicated region body
PF: predicated region fallthrough
CT: control target
= control target key end

     0   :  { %12 = vsyncpa [#allocation3], 0  ;;  %s2764_s0 = inlined_call_operand.hbm [shape: f32[2,16,16], index: 0, kind: input, shape index: {}]   ;;  %s2765_s1 = inlined_call_operand.hbm [shape: f32[2,16,16], index: 1, kind: input, shape index: {}]   ;;  %s2766_s2 = inlined_call_operand.hbm [shape: f32[16,16], index: 2, kind: input, shape index: {}, may-alias: {2,3}]   ;;  %s2767_s3 = inlined_call_operand.hbm [shape: f32[16,16], index: 3, kind: input, shape index: {}, may-alias: {2,3}]   ;;  %s2768_s4 = inlined_call_operand.vmem [shape: f32[16,16], index: 4, kind: input, shape index: {}, may-alias: {4,5}]   ;;  %s2769_s5 = inlined_call_operand.vmem [shape: f32[16,16], index: 5, kind: input, shape index: {}, may-alias: {4,5}]   ;;  %s2770_s6 = inlined_call_operand.vmem [shape: f32[16,16], index: 6, kind: input, shape index: {}]   ;;  %s2771_s7 = inlined_call_operand.vmem [shape: f32[1,1,128], index: 7, kind: output, shape index: {}]  }
   0x1   :  { %13 = vsyncpa [#allocation5], 0 }
   0x2   :  { %14 = vsyncpa [#allocation8], 0  ;;  %s2245_s24 = smov [#allocation4]   ;;  %s2246_s26 = smov [#allocation2]  }
   0x3   :  { %s32_s25 = sshll.u32 %s2245_s24, 4  ;;  %s20_s27 = sshll.u32 %s2246_s26, 4  ;;  %s33_s25 = int_to_ptr.vmem [resolvable:$true] %s32_s25  ;;  %s2293_s27 = int_to_ptr.vmem [resolvable:$true] %s20_s27 }
   0x4   :  { %s2151_s30 = scalar_lea.hbm %s2765_s1, 512 }
   0x5   :  { %p2152_p0 = scmp.ne.s32.totalorder %s2765_s1, %s2151_s30  ;;  %p2155_p1 = scmp.lt.u32.totalorder %s2151_s30, %s2765_s1 }
   0x7   :  { %p2157_p2 = pnand %p2155_p1, %p2152_p0 }
   0x9   :  { %2160 = shalt.err (!%p2157_p2)
}
   0xa   :  { %s2161_s12 = scalar_lea.vmem %s33_s25, 512  ;;  %p2166_p4 = scmp.lt.s32.totalorder %s33_s25, %s33_s25 }
   0xb   :  { %p2162_p3 = scmp.ne.s32.totalorder %s33_s25, %s2161_s12  ;;  %p2167_p5 = scmp.lt.s32.totalorder %s2161_s12, %s2161_s12 }
   0xd   :  { %p2168_p6 = por %p2167_p5, %p2166_p4 }
   0xf   :  { %p2169_p7 = pnand %p2168_p6, %p2162_p3 }
  0x11   :  { %2172 = shalt.err (!%p2169_p7)
}
  0x12   :  { %s2247_s13 = smov 128   ;;  %s2248_s14 = smov 8  }
  0x13   :  { %38 = dma.hbm_to_vmem [thread:$0]  %s2765_s1, 512, %s33_s25, [#allocation5], %s2247_s13, %s2247_s13, %s2248_s14  }
  0x14   :  { %s2173_s19 = scalar_lea.hbm %s2764_s0, 512 }
  0x15   :  { %p2174_p8 = scmp.ne.s32.totalorder %s2764_s0, %s2173_s19  ;;  %p2177_p9 = scmp.lt.u32.totalorder %s2173_s19, %s2764_s0 }
  0x17   :  { %p2179_p10 = pnand %p2177_p9, %p2174_p8 }
  0x19   :  { %2182 = shalt.err (!%p2179_p10)
}
  0x1a   :  { %s2183_s24 = scalar_lea.vmem %s2293_s27, 512  ;;  %p2188_p12 = scmp.lt.s32.totalorder %s2293_s27, %s2293_s27 }
  0x1b   :  { %p2184_p11 = scmp.ne.s32.totalorder %s2293_s27, %s2183_s24  ;;  %p2189_p13 = scmp.lt.s32.totalorder %s2183_s24, %s2183_s24 }
  0x1d   :  { %p2190_p0 = por %p2189_p13, %p2188_p12 }
  0x1f   :  { %p2191_p1 = pnand %p2190_p0, %p2184_p11 }
  0x21   :  { %2194 = shalt.err (!%p2191_p1)
}
  0x22   :  { %26 = dma.hbm_to_vmem [thread:$0]  %s2764_s0, 512, %s2293_s27, [#allocation3], %s2247_s13, %s2247_s13, %s2248_s14  }
  0x23   :  { %s2249_s26 = smov [#allocation6]   ;;  %s2250_s29 = smov [#allocation7]  }
  0x24   :  { %s44_s28 = sshll.u32 %s2249_s26, 4  ;;  %s56_s30 = sshll.u32 %s2250_s29, 4  ;;  %s45_s28 = int_to_ptr.vmem [resolvable:$true] %s44_s28  ;;  %s2330_s30 = int_to_ptr.vmem [resolvable:$true] %s56_s30 }
  0x25   :  { %s2195_s10 = scalar_lea.hbm %s2766_s2, 256 }
  0x26   :  { %p2196_p2 = scmp.ne.s32.totalorder %s2766_s2, %s2195_s10  ;;  %p2199_p3 = scmp.lt.u32.totalorder %s2195_s10, %s2766_s2 }
  0x28   :  { %p2201_p4 = pnand %p2199_p3, %p2196_p2 }
  0x2a   :  { %2204 = shalt.err (!%p2201_p4)
}
  0x2b   :  { %s2205_s0 = scalar_lea.vmem %s45_s28, 256  ;;  %p2210_p6 = scmp.lt.s32.totalorder %s45_s28, %s45_s28 }
  0x2c   :  { %p2206_p5 = scmp.ne.s32.totalorder %s45_s28, %s2205_s0  ;;  %p2211_p7 = scmp.lt.s32.totalorder %s2205_s0, %s2205_s0 }
  0x2e   :  { %p2212_p8 = por %p2211_p7, %p2210_p6 }
  0x30   :  { %p2213_p9 = pnand %p2212_p8, %p2206_p5 }
  0x32   :  { %2216 = shalt.err (!%p2213_p9)
}
  0x33   :  { %50 = dma.hbm_to_vmem [thread:$0]  %s2766_s2, 256, %s45_s28, [#allocation5], %s2247_s13, %s2247_s13, %s2248_s14  }
  0x34   :  { %s2217_s20 = scalar_lea.hbm %s2767_s3, 256 }
  0x35   :  { %p2218_p10 = scmp.ne.s32.totalorder %s2767_s3, %s2217_s20  ;;  %p2221_p11 = scmp.lt.u32.totalorder %s2217_s20, %s2767_s3 }
  0x37   :  { %p2223_p12 = pnand %p2221_p11, %p2218_p10 }
  0x39   :  { %2226 = shalt.err (!%p2223_p12)
}
  0x3a   :  { %s2227_s1 = scalar_lea.vmem %s2330_s30, 256  ;;  %p2232_p0 = scmp.lt.s32.totalorder %s2330_s30, %s2330_s30 }
  0x3b   :  { %p2228_p13 = scmp.ne.s32.totalorder %s2330_s30, %s2227_s1  ;;  %p2233_p1 = scmp.lt.s32.totalorder %s2227_s1, %s2227_s1 }
  0x3d   :  { %p2234_p2 = por %p2233_p1, %p2232_p0 }
  0x3f   :  { %p2235_p3 = pnand %p2234_p2, %p2228_p13 }
  0x41   :  { %2238 = shalt.err (!%p2235_p3)
}
  0x42   :  { %62 = dma.hbm_to_vmem [thread:$0]  %s2767_s3, 256, %s2330_s30, [#allocation8], %s2247_s13, %s2247_s13, %s2248_s14  }
  0x43   :  { %2239 = dma.done.wait [#allocation3], 512  }
  0x44   :  { %2240 = vsyncadd [#allocation3], 4294966784 }
  0x45   :  { %2241 = dma.done.wait [#allocation5], 768  }
  0x46   :  { %2242 = vsyncadd [#allocation5], 4294966528 }
  0x47   :  { %2243 = dma.done.wait [#allocation8], 256  }
  0x48   :  { %2244 = vsyncadd [#allocation8], 4294967040  ;;  %vm107_vm0 = vcmask 130048   ;;  %v89_v0 = vld [vmem:[#allocation6] sm:$0xff]  ;;  %v90_v1 = vld [vmem:[#allocation6 + $0x8] sm:$0xff]  ;;  %vm1657_vm1 = vcmask 1047680  }
  0x49   :  { %v2367_v2 = vld [vmem:[#allocation2] sm:$0xff]  ;;  %v2096_v3 = vpack.c.bf16 %v90_v1, %v89_v0  ;;  %v94_v5 = vld [vmem:[%s2768_s4 + $0x8] sm:$0xff]  ;;  %v2379_v8 = vld [vmem:[#allocation2 + $0x10] sm:$0xff]  ;;  %s2252_s8 = smov 113  }
  0x4a   :  { %2000 = vmatprep.mubr.msk.f32.mxu0 %vm107_vm0, %v2367_v2  ;;  %v93_v4 = vld [vmem:[%s2768_s4] sm:$0xff]  ;;  %v2377_v7 = vld [vmem:[#allocation2 + $0x8] sm:$0xff]  ;;  %v2385_v9 = vld [vmem:[#allocation2 + $0x18] sm:$0xff]  ;;  %v124_v14 = vmul.f32 %v2367_v2, %v2367_v2  ;;  %v126_v16 = vmul.f32 %v2379_v8, %v2379_v8 }
  0x4b   :  { %v2104_v6 = vpack.c.bf16 %v94_v5, %v93_v4  ;;  %2097 = vmatprep.subr.bf16.mxu0 %v2096_v3  ;;  %v2387_v10 = vld [vmem:[#allocation4] sm:$0xff]  ;;  %v2393_v11 = vld [vmem:[#allocation4 + $0x8] sm:$0xff]  ;;  %v2395_v12 = vld [vmem:[#allocation4 + $0x10] sm:$0xff]  ;;  %v125_v15 = vmul.f32 %v2377_v7, %v2377_v7  ;;  %v127_v17 = vmul.f32 %v2385_v9, %v2385_v9 }
  0x4c   :  { %2099 = vmatpush3.bf16.msra.mxu0 %v2096_v3  ;;  %v2401_v13 = vld [vmem:[#allocation4 + $0x18] sm:$0xff]  ;;  %v128_v18 = vmul.f32 %v2387_v10, %v2387_v10  ;;  %v129_v19 = vmul.f32 %v2393_v11, %v2393_v11  ;;  %v130_v20 = vmul.f32 %v2395_v12, %v2395_v12  ;;  %v132_v22 = vmul.f32 %v2387_v10, %v2367_v2  ;;  %v91_v27 = vld [vmem:[#allocation7] sm:$0xff]  ;;  %v95_v50 = vld [vmem:[%s2769_s5] sm:$0xff] }
  0x4d   :  { %2105 = vmatprep.subr.bf16.mxu0 %v2104_v6  ;;  %v131_v21 = vmul.f32 %v2401_v13, %v2401_v13  ;;  %v133_v23 = vmul.f32 %v2393_v11, %v2377_v7  ;;  %v134_v24 = vmul.f32 %v2395_v12, %v2379_v8  ;;  %v135_v25 = vmul.f32 %v2401_v13, %v2385_v9  ;;  %v92_v28 = vld [vmem:[#allocation7 + $0x8] sm:$0xff]  ;;  %v96_v51 = vld [vmem:[%s2769_s5 + $0x8] sm:$0xff]  ;;  %s2251_s5 = smov 16  }
  0x4e   :  { %v2100_v30 = vpack.c.bf16 %v92_v28, %v91_v27  ;;  %v2108_v53 = vpack.c.bf16 %v96_v51, %v95_v50 }
  0x4f   :  { %2001 = vmatmul.mubr.msk.f32.vlgmr.msra.gmra.mrb[0].mxu0 %vm107_vm0, %v2377_v7 }
  0x50   :  { %2107 = vmatpush3.bf16.msra.mxu0 %v2104_v6  ;;  %2003 = vmatprep.mubr.msk.f32.mxu0 %vm107_vm0, %v2379_v8 }
  0x51   :  { %2101 = vmatprep.subr.bf16.mxu1 %v2100_v30 }
  0x52   :  { %2103 = vmatpush3.bf16.msra.mxu1 %v2100_v30 }
  0x53   :  { %2004 = vmatmul.mubr.msk.f32.gmra.mrb[2].mxu0 %vm107_vm0, %v2385_v9  ;;  %2109 = vmatprep.subr.bf16.mxu1 %v2108_v53 }
  0x54   :  { %2006 = vmatprep.mubr.msk.f32.mxu0 %vm107_vm0, %v2387_v10 }
  0x57   :  { %2007 = vmatmul.mubr.msk.f32.gmra.mrb[4].mxu0 %vm107_vm0, %v2393_v11 }
  0x58   :  { %2009 = vmatprep.mubr.msk.f32.mxu0 %vm107_vm0, %v2395_v12 }
  0x5b   :  { %2010 = vmatmul.mubr.msk.f32.gmra.mrb[6].mxu0 %vm107_vm0, %v2401_v13 }
  0x5c   :  { %2012 = vmatprep.mubr.msk.f32.mxu0 %vm107_vm0, %v124_v14 }
  0x5f   :  { %2013 = vmatmul.mubr.msk.f32.gmra.mrb[8].mxu0 %vm107_vm0, %v125_v15 }
  0x60   :  { %2015 = vmatprep.mubr.msk.f32.mxu0 %vm107_vm0, %v126_v16 }
  0x63   :  { %2016 = vmatmul.mubr.msk.f32.gmra.mrb[10].mxu0 %vm107_vm0, %v127_v17 }
  0x64   :  { %2018 = vmatprep.mubr.msk.f32.mxu0 %vm107_vm0, %v128_v18 }
  0x67   :  { %2019 = vmatmul.mubr.msk.f32.gmra.mrb[12].mxu0 %vm107_vm0, %v129_v19 }
  0x68   :  { %2021 = vmatprep.mubr.msk.f32.mxu0 %vm107_vm0, %v130_v20 }
  0x6b   :  { %2022 = vmatmul.mubr.msk.f32.gmra.mrb[14].mxu0 %vm107_vm0, %v131_v21 }
  0x6c   :  { %2024 = vmatprep.mubr.msk.f32.mxu0 %vm107_vm0, %v132_v22 }
  0x6f   :  { %2025 = vmatmul.mubr.msk.f32.gmra.mrb[16].mxu0 %vm107_vm0, %v133_v23 }
  0x70   :  { %2027 = vmatprep.mubr.msk.f32.mxu0 %vm107_vm0, %v134_v24 }
  0x73   :  { %2028 = vmatmul.mubr.msk.f32.gmra.mrb[18].mxu0 %vm107_vm0, %v135_v25 }
  0x74   :  { %2068 = vmatprep.mubr.msk.f32.mxu0 %vm107_vm0, %v2367_v2 }
  0x77   :  { %2069 = vmatmul.mubr.msk.f32.vlgmr.msra.gmra.mrb[20].mxu0 %vm107_vm0, %v2377_v7 }
  0x78   :  { %2071 = vmatprep.mubr.msk.f32.mxu0 %vm107_vm0, %v2379_v8 }
  0x7b   :  { %2072 = vmatmul.mubr.msk.f32.gmra.mrb[22].mxu0 %vm107_vm0, %v2385_v9 }
  0x7c   :  { %2074 = vmatprep.mubr.msk.f32.mxu0 %vm107_vm0, %v2387_v10 }
  0x7f   :  { %2075 = vmatmul.mubr.msk.f32.gmra.mrb[24].mxu0 %vm107_vm0, %v2393_v11 }
  0x80   :  { %2077 = vmatprep.mubr.msk.f32.mxu0 %vm107_vm0, %v2395_v12 }
  0x83   :  { %2078 = vmatmul.mubr.msk.f32.gmra.mrb[26].mxu0 %vm107_vm0, %v2401_v13 }
 0x122   :  { %v2002_v26 = vpop.f32.mrb[0].mxu0 }
 0x123   :  { %v262_v29 = vpop.f32.mrb[1].mxu0 }
 0x124   :  { %361 = vxpose.xlu0.b32.start [1/2] (short) (narrow) %v262_v29, 16 }
 0x126   :  { %v2005_v31 = vpop.f32.mrb[2].mxu0 }
 0x127   :  { %v272_v32 = vpop.f32.mrb[3].mxu0 }
 0x128   :  { %362 = vxpose.xlu0.b32.end [2/2] (short) (narrow) %v2002_v26, 16  ;;  %393 = vxpose.xlu1.b32.start [1/2] (short) (narrow) %v272_v32, 16 }
 0x12a   :  { %v2008_v33 = vpop.f32.mrb[4].mxu0 }
 0x12b   :  { %v282_v34 = vpop.f32.mrb[5].mxu0 }
 0x12c   :  { %394 = vxpose.xlu1.b32.end [2/2] (short) (narrow) %v2005_v31, 16  ;;  %425 = vxpose.xlu0.b32.start [1/2] (short) (narrow) %v282_v34, 16 }
 0x12e   :  { %v2011_v35 = vpop.f32.mrb[6].mxu0 }
 0x12f   :  { %v292_v36 = vpop.f32.mrb[7].mxu0 }
 0x130   :  { %426 = vxpose.xlu0.b32.end [2/2] (short) (narrow) %v2008_v33, 16  ;;  %457 = vxpose.xlu1.b32.start [1/2] (short) (narrow) %v292_v36, 16 }
 0x132   :  { %v2014_v37 = vpop.f32.mrb[8].mxu0 }
 0x133   :  { %v302_v38 = vpop.f32.mrb[9].mxu0 }
 0x134   :  { %458 = vxpose.xlu1.b32.end [2/2] (short) (narrow) %v2011_v35, 16  ;;  %489 = vxpose.xlu0.b32.start [1/2] (short) (narrow) %v302_v38, 16 }
 0x136   :  { %v2017_v39 = vpop.f32.mrb[10].mxu0 }
 0x137   :  { %v312_v40 = vpop.f32.mrb[11].mxu0 }
 0x138   :  { %490 = vxpose.xlu0.b32.end [2/2] (short) (narrow) %v2014_v37, 16  ;;  %521 = vxpose.xlu1.b32.start [1/2] (short) (narrow) %v312_v40, 16 }
 0x13a   :  { %v2020_v41 = vpop.f32.mrb[12].mxu0 }
 0x13b   :  { %v322_v42 = vpop.f32.mrb[13].mxu0 }
 0x13c   :  { %522 = vxpose.xlu1.b32.end [2/2] (short) (narrow) %v2017_v39, 16  ;;  %553 = vxpose.xlu0.b32.start [1/2] (short) (narrow) %v322_v42, 16 }
 0x13e   :  { %v2023_v43 = vpop.f32.mrb[14].mxu0 }
 0x13f   :  { %v332_v44 = vpop.f32.mrb[15].mxu0 }
 0x140   :  { %554 = vxpose.xlu0.b32.end [2/2] (short) (narrow) %v2020_v41, 16  ;;  %585 = vxpose.xlu1.b32.start [1/2] (short) (narrow) %v332_v44, 16 }
 0x142   :  { %v2026_v45 = vpop.f32.mrb[16].mxu0 }
 0x143   :  { %v342_v46 = vpop.f32.mrb[17].mxu0 }
 0x144   :  { %586 = vxpose.xlu1.b32.end [2/2] (short) (narrow) %v2023_v43, 16  ;;  %617 = vxpose.xlu0.b32.start [1/2] (short) (narrow) %v342_v46, 16 }
 0x146   :  { %v2029_v47 = vpop.f32.mrb[18].mxu0 }
 0x147   :  { %v352_v48 = vpop.f32.mrb[19].mxu0 }
 0x148   :  { %618 = vxpose.xlu0.b32.end [2/2] (short) (narrow) %v2026_v45, 16  ;;  %649 = vxpose.xlu1.b32.start [1/2] (short) (narrow) %v352_v48, 16 }
 0x14a   :  { %v2070_v49 = vpop.f32.mrb[20].mxu0 }
 0x14b   :  { %v1060_v52 = vpop.f32.mrb[21].mxu0 }
 0x14c   :  { %650 = vxpose.xlu1.b32.end [2/2] (short) (narrow) %v2029_v47, 16  ;;  %1099 = vxpose.xlu0.b32.start [1/2] (short) (narrow) %v1060_v52, 16 }
 0x14e   :  { %v2073_v54 = vpop.f32.mrb[22].mxu0 }
 0x14f   :  { %v1070_v55 = vpop.f32.mrb[23].mxu0 }
 0x150   :  { %1100 = vxpose.xlu0.b32.end [2/2] (short) (narrow) %v2070_v49, 16  ;;  %1131 = vxpose.xlu1.b32.start [1/2] (short) (narrow) %v1070_v55, 16 }
 0x152   :  { %v2076_v56 = vpop.f32.mrb[24].mxu0 }
 0x153   :  { %v1080_v57 = vpop.f32.mrb[25].mxu0 }
 0x154   :  { %1132 = vxpose.xlu1.b32.end [2/2] (short) (narrow) %v2073_v54, 16  ;;  %1163 = vxpose.xlu0.b32.start [1/2] (short) (narrow) %v1080_v57, 16 }
 0x156   :  { %v2079_v58 = vpop.f32.mrb[26].mxu0 }
 0x157   :  { %v1090_v59 = vpop.f32.mrb[27].mxu0 }
 0x158   :  { %1164 = vxpose.xlu0.b32.end [2/2] (short) (narrow) %v2076_v56, 16  ;;  %1195 = vxpose.xlu1.b32.start [1/2] (short) (narrow) %v1090_v59, 16 }
 0x15c   :  { %1380 = vxpose.xlu0.b32.start [1/2] (short) (narrow) %v2367_v2, 16  ;;  %1196 = vxpose.xlu1.b32.end [2/2] (short) (narrow) %v2079_v58, 16 }
 0x160   :  { %1381 = vxpose.xlu0.b32.end [2/2] (short) (narrow) %v2377_v7, 16  ;;  %1444 = vxpose.xlu1.b32.start [1/2] (short) (narrow) %v2387_v10, 16 }
 0x164   :  { %1412 = vxpose.xlu0.b32.start [1/2] (short) (narrow) %v2379_v8, 16  ;;  %1445 = vxpose.xlu1.b32.end [2/2] (short) (narrow) %v2393_v11, 16 }
 0x168   :  { %1413 = vxpose.xlu0.b32.end [2/2] (short) (narrow) %v2385_v9, 16  ;;  %1476 = vxpose.xlu1.b32.start [1/2] (short) (narrow) %v2395_v12, 16 }
 0x16c   :  { %1477 = vxpose.xlu1.b32.end [2/2] (short) (narrow) %v2401_v13, 16 }
 0x1a4   :  { %v377_v60 = vpop.trf.xlu0 }
 0x1a5   :  { %2034 = vmatprep.mubr.msk.f32.mxu1 %vm107_vm0, %v377_v60 }
 0x1a8   :  { %v378_v61 = vpop.trf.xlu0  ;;  %v409_v62 = vpop.trf.xlu1 }
 0x1a9   :  { %2035 = vmatmul.mubr.msk.f32.vlgmr.msra.gmra.mrb[0].mxu1 %vm107_vm0, %v378_v61 }
 0x1aa   :  { %2037 = vmatprep.mubr.msk.f32.mxu1 %vm107_vm0, %v409_v62  ;;  %2111 = vmatpush3.bf16.msra.mxu1 %v2108_v53 }
 0x1ac   :  { %v410_v63 = vpop.trf.xlu1  ;;  %v441_v0 = vpop.trf.xlu0 }
 0x1ad   :  { %2038 = vmatmul.mubr.msk.f32.gmra.mrb[2].mxu1 %vm107_vm0, %v410_v63 }
 0x1ae   :  { %2040 = vmatprep.mubr.msk.f32.mxu1 %vm107_vm0, %v441_v0 }
 0x1b0   :  { %v442_v1 = vpop.trf.xlu0  ;;  %v473_v3 = vpop.trf.xlu1 }
 0x1b1   :  { %2041 = vmatmul.mubr.msk.f32.gmra.mrb[4].mxu1 %vm107_vm0, %v442_v1 }
 0x1b2   :  { %2043 = vmatprep.mubr.msk.f32.mxu1 %vm107_vm0, %v473_v3 }
 0x1b4   :  { %v474_v4 = vpop.trf.xlu1  ;;  %v505_v5 = vpop.trf.xlu0 }
 0x1b5   :  { %2044 = vmatmul.mubr.msk.f32.gmra.mrb[6].mxu1 %vm107_vm0, %v474_v4 }
 0x1b6   :  { %2046 = vmatprep.mubr.msk.f32.mxu1 %vm107_vm0, %v505_v5 }
 0x1b8   :  { %v506_v6 = vpop.trf.xlu0  ;;  %v537_v14 = vpop.trf.xlu1 }
 0x1b9   :  { %2047 = vmatmul.mubr.msk.f32.gmra.mrb[8].mxu1 %vm107_vm0, %v506_v6 }
 0x1ba   :  { %2049 = vmatprep.mubr.msk.f32.mxu1 %vm107_vm0, %v537_v14 }
 0x1bc   :  { %v538_v15 = vpop.trf.xlu1  ;;  %v569_v16 = vpop.trf.xlu0 }
 0x1bd   :  { %2050 = vmatmul.mubr.msk.f32.gmra.mrb[10].mxu1 %vm107_vm0, %v538_v15 }
 0x1be   :  { %2052 = vmatprep.mubr.msk.f32.mxu1 %vm107_vm0, %v569_v16 }
 0x1c0   :  { %v570_v17 = vpop.trf.xlu0  ;;  %v601_v18 = vpop.trf.xlu1 }
 0x1c1   :  { %2053 = vmatmul.mubr.msk.f32.gmra.mrb[12].mxu1 %vm107_vm0, %v570_v17 }
 0x1c2   :  { %2055 = vmatprep.mubr.msk.f32.mxu1 %vm107_vm0, %v601_v18 }
 0x1c4   :  { %v602_v19 = vpop.trf.xlu1  ;;  %v633_v20 = vpop.trf.xlu0 }
 0x1c5   :  { %2056 = vmatmul.mubr.msk.f32.gmra.mrb[14].mxu1 %vm107_vm0, %v602_v19 }
 0x1c6   :  { %2058 = vmatprep.mubr.msk.f32.mxu1 %vm107_vm0, %v633_v20 }
 0x1c8   :  { %v634_v21 = vpop.trf.xlu0  ;;  %v665_v22 = vpop.trf.xlu1 }
 0x1c9   :  { %2059 = vmatmul.mubr.msk.f32.gmra.mrb[16].mxu1 %vm107_vm0, %v634_v21 }
 0x1ca   :  { %2061 = vmatprep.mubr.msk.f32.mxu1 %vm107_vm0, %v665_v22 }
 0x1cc   :  { %v666_v23 = vpop.trf.xlu1  ;;  %v1115_v24 = vpop.trf.xlu0 }
 0x1cd   :  { %2062 = vmatmul.mubr.msk.f32.gmra.mrb[18].mxu1 %vm107_vm0, %v666_v23 }
 0x1ce   :  { %2084 = vmatprep.mubr.msk.f32.mxu1 %vm107_vm0, %v1115_v24 }
 0x1d0   :  { %v1116_v25 = vpop.trf.xlu0  ;;  %v1147_v26 = vpop.trf.xlu1 }
 0x1d1   :  { %2085 = vmatmul.mubr.msk.f32.vlgmr.msra.gmra.mrb[20].mxu1 %vm107_vm0, %v1116_v25 }
 0x1d2   :  { %2087 = vmatprep.mubr.msk.f32.mxu1 %vm107_vm0, %v1147_v26 }
 0x1d4   :  { %v1148_v27 = vpop.trf.xlu1  ;;  %v1179_v28 = vpop.trf.xlu0 }
 0x1d5   :  { %2088 = vmatmul.mubr.msk.f32.gmra.mrb[22].mxu1 %vm107_vm0, %v1148_v27 }
 0x1d6   :  { %2090 = vmatprep.mubr.msk.f32.mxu1 %vm107_vm0, %v1179_v28 }
 0x1d8   :  { %v1180_v29 = vpop.trf.xlu0  ;;  %v1211_v30 = vpop.trf.xlu1 }
 0x1d9   :  { %2091 = vmatmul.mubr.msk.f32.gmra.mrb[24].mxu1 %vm107_vm0, %v1180_v29 }
 0x1da   :  { %2093 = vmatprep.mubr.msk.f32.mxu1 %vm107_vm0, %v1211_v30 }
 0x1dc   :  { %v2498_v31 = vpop.trf.xlu0  ;;  %v1212_v32 = vpop.trf.xlu1 }
 0x1dd   :  { %1658 = vrot.lane.b32.xlu0 %v2498_v31, %s2251_s5  ;;  %2094 = vmatmul.mubr.msk.f32.gmra.mrb[26].mxu1 %vm107_vm0, %v1212_v32 }
 0x1e0   :  { %v2503_v33 = vpop.trf.xlu0  ;;  %v2505_v34 = vpop.trf.xlu1 }
 0x1e1   :  { %1661 = vrot.lane.b32.xlu1 %v2503_v33, %s2251_s5 }
 0x1e4   :  { %v2509_v35 = vpop.trf.xlu1  ;;  %v2519_v37 = vpop.trf.xlu0 }
 0x1e5   :  { %1670 = vrot.lane.b32.xlu1 %v2505_v34, %s2251_s5 }
 0x1e8   :  { %v2513_v36 = vpop.trf.xlu1  ;;  %v2527_v39 = vpop.trf.xlu0 }
 0x1e9   :  { %1673 = vrot.lane.b32.xlu1 %v2509_v35, %s2251_s5  ;;  %1676 = vrot.lane.b32.xlu0 %v2513_v36, %s2251_s5 }
 0x1ec   :  { %v2521_v38 = vpop.trf.xlu1 }
 0x1ed   :  { %1664 = vrot.lane.b32.xlu1 %v2519_v37, %s2251_s5  ;;  %1679 = vrot.lane.b32.xlu0 %v2521_v38, %s2251_s5 }
 0x1f1   :  { %1667 = vrot.lane.b32.xlu1 %v2527_v39, %s2251_s5 }
 0x24f   :  { %v1659_v40 = vpop.permute.xlu0 %1658 }
 0x250   :  { %v1660_v41 = vsel %vm1657_vm1, %v1659_v40, %v2498_v31 }
 0x251   :  { %1682 = vrot.lane.b32.xlu1 %v1660_v41, %s2251_s5 }
 0x253   :  { %v1662_v42 = vpop.permute.xlu1 %1661 }
 0x254   :  { %v1663_v43 = vsel %vm1657_vm1, %v1662_v42, %v2503_v33 }
 0x255   :  { %1684 = vrot.lane.b32.xlu0 %v1663_v43, %s2251_s5 }
 0x257   :  { %v1671_v44 = vpop.permute.xlu1 %1670 }
 0x258   :  { %v1672_v45 = vsel %vm1657_vm1, %v1671_v44, %v2505_v34 }
 0x259   :  { %1690 = vrot.lane.b32.xlu1 %v1672_v45, %s2251_s5 }
 0x25b   :  { %v1677_v46 = vpop.permute.xlu0 %1676  ;;  %v1674_v47 = vpop.permute.xlu1 %1673 }
 0x25c   :  { %v1675_v48 = vsel %vm1657_vm1, %v1674_v47, %v2509_v35  ;;  %v1678_v50 = vsel %vm1657_vm1, %v1677_v46, %v2513_v36 }
 0x25d   :  { %1692 = vrot.lane.b32.xlu0 %v1675_v48, %s2251_s5 }
 0x25f   :  { %v1665_v49 = vpop.permute.xlu1 %1664  ;;  %v1680_v52 = vpop.permute.xlu0 %1679 }
 0x260   :  { %v1666_v51 = vsel %vm1657_vm1, %v1665_v49, %v2519_v37  ;;  %v1681_v54 = vsel %vm1657_vm1, %v1680_v52, %v2521_v38 }
 0x261   :  { %1694 = vrot.lane.b32.xlu0 %v1678_v50, %s2251_s5  ;;  %1686 = vrot.lane.b32.xlu1 %v1666_v51, %s2251_s5 }
 0x263   :  { %v1668_v53 = vpop.permute.xlu1 %1667 }
 0x264   :  { %v1669_v55 = vsel %vm1657_vm1, %v1668_v53, %v2527_v39 }
 0x265   :  { %1696 = vrot.lane.b32.xlu0 %v1681_v54, %s2251_s5  ;;  %1688 = vrot.lane.b32.xlu1 %v1669_v55, %s2251_s5 }
 0x27c   :  { %v2036_v56 = vpop.f32.mrb[0].mxu1 }
 0x27d   :  { %v807_v57 = vpop.f32.mrb[1].mxu1  ;;  %v907_v61 = vmul.f32 %v2036_v56, %v2036_v56 }
 0x27e   :  { %v906_v1 = vmul.f32 %v807_v57, %v807_v57 }
 0x280   :  { %v2039_v58 = vpop.f32.mrb[2].mxu1 }
 0x281   :  { %v817_v59 = vpop.f32.mrb[3].mxu1  ;;  %v909_v15 = vmul.f32 %v2039_v58, %v2039_v58 }
 0x282   :  { %v908_v19 = vmul.f32 %v817_v59, %v817_v59 }
 0x284   :  { %v2042_v60 = vpop.f32.mrb[4].mxu1 }
 0x285   :  { %v911_v62 = vmul.f32 %v2042_v60, %v2042_v60  ;;  %v915_v63 = vmul.f32 %v2042_v60, %v2036_v56  ;;  %v827_v0 = vpop.f32.mrb[5].mxu1 }
 0x286   :  { %v910_v3 = vmul.f32 %v827_v0, %v827_v0  ;;  %v914_v4 = vmul.f32 %v827_v0, %v807_v57 }
 0x287   :  { %v951_v5 = vadd.f32 %v911_v62, %v907_v61  ;;  %v931_v56 = vmul.f32 2.0, %v915_v63 }
 0x288   :  { %v950_v6 = vadd.f32 %v910_v3, %v906_v1  ;;  %v2045_v14 = vpop.f32.mrb[6].mxu1  ;;  %v930_v57 = vmul.f32 2.0, %v914_v4 }
 0x289   :  { %v913_v16 = vmul.f32 %v2045_v14, %v2045_v14  ;;  %v917_v17 = vmul.f32 %v2045_v14, %v2039_v58  ;;  %v837_v18 = vpop.f32.mrb[7].mxu1  ;;  %v955_v47 = vadd.f32 0.0001, %v951_v5 }
 0x28a   :  { %v912_v20 = vmul.f32 %v837_v18, %v837_v18  ;;  %v916_v21 = vmul.f32 %v837_v18, %v817_v59  ;;  %v954_v51 = vadd.f32 0.0001, %v950_v6  ;;  %v934_v18 = vadd.f32 0.0001, %v930_v57 }
 0x28b   :  { %v953_v22 = vadd.f32 %v913_v16, %v909_v15 }
 0x28c   :  { %v952_v23 = vadd.f32 %v912_v20, %v908_v19  ;;  %v2048_v24 = vpop.f32.mrb[8].mxu1 }
 0x28d   :  { %v919_v25 = vsub.f32 %v2048_v24, %v907_v61  ;;  %v847_v26 = vpop.f32.mrb[9].mxu1  ;;  %v957_v61 = vadd.f32 0.0001, %v953_v22 }
 0x28e   :  { %v918_v27 = vsub.f32 %v847_v26, %v906_v1 }
 0x290   :  { %v2051_v28 = vpop.f32.mrb[10].mxu1 }
 0x291   :  { %v921_v29 = vsub.f32 %v2051_v28, %v909_v15  ;;  %v857_v30 = vpop.f32.mrb[11].mxu1  ;;  %v932_v28 = vmul.f32 2.0, %v916_v21 }
 0x292   :  { %v920_v32 = vsub.f32 %v857_v30, %v908_v19 }
 0x294   :  { %v2054_v40 = vpop.f32.mrb[12].mxu1 }
 0x295   :  { %v923_v41 = vsub.f32 %v2054_v40, %v911_v62  ;;  %v867_v42 = vpop.f32.mrb[13].mxu1 }
 0x296   :  { %v922_v43 = vsub.f32 %v867_v42, %v910_v3  ;;  %v956_v3 = vadd.f32 0.0001, %v952_v23 }
 0x297   :  { %v959_v44 = vadd.f32 %v923_v41, %v919_v25  ;;  %v933_v25 = vmul.f32 2.0, %v917_v17 }
 0x298   :  { %v958_v45 = vadd.f32 %v922_v43, %v918_v27  ;;  %v2057_v46 = vpop.f32.mrb[14].mxu1 }
 0x299   :  { %v963_v48 = vadd.f32 0.0009, %v959_v44  ;;  %v925_v49 = vsub.f32 %v2057_v46, %v913_v16  ;;  %v877_v50 = vpop.f32.mrb[15].mxu1  ;;  %v935_v16 = vadd.f32 0.0001, %v931_v56 }
 0x29a   :  { %v962_v52 = vadd.f32 0.0009, %v958_v45  ;;  %v924_v53 = vsub.f32 %v877_v50, %v912_v20  ;;  %v937_v41 = vadd.f32 0.0001, %v933_v25  ;;  %v936_v44 = vadd.f32 0.0001, %v932_v28 }
 0x29b   :  { %v967_v54 = vmul.f32 %v963_v48, %v955_v47  ;;  %v961_v55 = vadd.f32 %v925_v49, %v921_v29 }
 0x29c   :  { %v966_v58 = vmul.f32 %v962_v52, %v954_v51  ;;  %v960_v59 = vadd.f32 %v924_v53, %v920_v32  ;;  %v2060_v60 = vpop.f32.mrb[16].mxu1 }
 0x29d   :  { %2127 = vrcp.f32 %v967_v54  ;;  %v965_v62 = vadd.f32 0.0009, %v961_v55  ;;  %v927_v0 = vsub.f32 %v2060_v60, %v915_v63  ;;  %v887_v1 = vpop.f32.mrb[17].mxu1 }
 0x29e   :  { %2129 = vrcp.f32 %v966_v58  ;;  %v964_v5 = vadd.f32 0.0009, %v960_v59  ;;  %v926_v14 = vsub.f32 %v887_v1, %v914_v4 }
 0x29f   :  { %v969_v15 = vmul.f32 %v965_v62, %v957_v61  ;;  %v939_v6 = vmul.f32 2.0, %v927_v0 }
 0x2a0   :  { %v968_v19 = vmul.f32 %v964_v5, %v956_v3  ;;  %v938_v20 = vmul.f32 2.0, %v926_v14  ;;  %v2063_v24 = vpop.f32.mrb[18].mxu1 }
 0x2a1   :  { %2131 = vrcp.f32 %v969_v15  ;;  %v943_v26 = vadd.f32 0.0009, %v939_v6  ;;  %v929_v27 = vsub.f32 %v2063_v24, %v917_v17  ;;  %v897_v22 = vpop.f32.mrb[19].mxu1 }
 0x2a2   :  { %2133 = vrcp.f32 %v968_v19  ;;  %v942_v63 = vadd.f32 0.0009, %v938_v20  ;;  %v928_v29 = vsub.f32 %v897_v22, %v916_v21 }
 0x2a3   :  { %v947_v23 = vmul.f32 %v943_v26, %v935_v16  ;;  %v941_v30 = vmul.f32 2.0, %v929_v27 }
 0x2a4   :  { %v946_v32 = vmul.f32 %v942_v63, %v934_v18  ;;  %v940_v4 = vmul.f32 2.0, %v928_v29  ;;  %v2555_v40 = vpop.f32.mrb[20].mxu1 }
 0x2a5   :  { %v945_v42 = vadd.f32 0.0009, %v941_v30  ;;  %v2557_v43 = vpop.f32.mrb[21].mxu1  ;;  %v99_v30 = vsub.f32 %v2367_v2, %v2387_v10 }
 0x2a6   :  { %v944_v45 = vadd.f32 0.0009, %v940_v4  ;;  %v101_v4 = vsub.f32 %v2379_v8, %v2395_v12  ;;  %v97_v8 = vld [vmem:[%s2770_s6] sm:$0xff] }
 0x2a7   :  { %v2128_v46 = vpop.eup %2127  ;;  %v949_v47 = vmul.f32 %v945_v42, %v937_v41  ;;  %v103_v41 = vmul.f32 %v99_v30, %v99_v30  ;;  %v1356_v12 = vmul.f32 %v2557_v43, %v97_v8 }
 0x2a8   :  { %v2130_v17 = vpop.eup %2129  ;;  %v975_v48 = vmul.f32 %v2128_v46, %v947_v23  ;;  %v948_v49 = vmul.f32 %v944_v45, %v936_v44  ;;  %v2559_v50 = vpop.f32.mrb[22].mxu1  ;;  %v102_v44 = vsub.f32 %v2385_v9, %v2401_v13  ;;  %v105_v45 = vmul.f32 %v101_v4, %v101_v4 }
 0x2a9   :  { %v974_v21 = vmul.f32 %v2130_v17, %v946_v32  ;;  %v2561_v51 = vpop.f32.mrb[23].mxu1  ;;  %v100_v32 = vsub.f32 %v2377_v7, %v2393_v11  ;;  %v108_v46 = vsel %vm107_vm0, %v103_v41, 0.0  ;;  %v1508_v9 = vlaneseq }
 0x2aa   :  { %v979_v52 = vsel %vm107_vm0, %v975_v48, 0.0  ;;  %v106_v48 = vmul.f32 %v102_v44, %v102_v44  ;;  %v111_v2 = vsel %vm107_vm0, %v105_v45, 0.0  ;;  %v1358_v43 = vmul.f32 %v2561_v51, %v97_v8 }
 0x2ab   :  { %v2132_v53 = vpop.eup %2131  ;;  %v978_v54 = vsel %vm107_vm0, %v974_v21, 0.0  ;;  %v104_v42 = vmul.f32 %v100_v32, %v100_v32 }
 0x2ac   :  { %v2134_v55 = vpop.eup %2133  ;;  %v2565_v56 = vpop.f32.mrb[24].mxu1  ;;  %v977_v57 = vmul.f32 %v2132_v53, %v949_v47  ;;  %v980_v58 = vadd.f32 %v979_v52, %v978_v54  ;;  %v113_v7 = vsel %vm107_vm0, %v106_v48, 0.0  ;;  %v1630_v52 = vrot.slane %v2521_v38, 7 }
 0x2ad   :  { %v976_v59 = vmul.f32 %v2134_v55, %v948_v49  ;;  %v1337_v60 = vpop.f32.mrb[25].mxu1  ;;  %v109_v47 = vsel %vm107_vm0, %v104_v42, 0.0  ;;  %v2605_v49 = vshrl.u32 %v1508_v9, 7  ;;  %v1364_v54 = vadd.f32 1e-08, %v1356_v12 }
 0x2ae   :  { %v983_v3 = vsel %vm107_vm0, %v977_v57, 0.0  ;;  %v110_v17 = vadd.f32 %v109_v47, %v108_v46  ;;  %v1360_v13 = vmul.f32 %v1337_v60, %v97_v8  ;;  %v2610_v55 = vand.u32 127, %v1508_v9 }
 0x2af   :  { %v981_v61 = vsel %vm107_vm0, %v976_v59, 0.0  ;;  %v1523_v21 = vand.u32 15, %v2605_v49  ;;  %v1513_v53 = vadd.s32 32, %v2605_v49  ;;  %vm1631_vm2 = vcmp.lt.s32.totalorder %v2605_v49, 1 }
 0x2b0   :  { %v2568_v62 = vpop.f32.mrb[26].mxu1  ;;  %v982_v0 = vadd.f32 %v981_v61, %v980_v58  ;;  %v112_v10 = vadd.f32 %v111_v2, %v110_v17  ;;  %v1368_v57 = vadd.f32 1e-08, %v1360_v13  ;;  %v1623_v58 = vrot.slane %v2498_v31, 7 }
 0x2b1   :  { %v2570_v1 = vpop.f32.mrb[27].mxu1  ;;  %v1511_v59 = vadd.s32 16, %v2605_v49  ;;  %vm2616_vm3 = vcmp.eq.s32.totalorder %v1523_v21, 0  ;;  %2135 = vrcp.f32 %v1364_v54  ;;  %vm1656_vm4 = vcmp.eq.s32.totalorder %v2610_v55, 0 }
 0x2b2   :  { %v984_v5 = vadd.f32 %v983_v3, %v982_v0  ;;  %v114_v11 = vadd.f32 %v113_v7, %v112_v10  ;;  %v1639_v61 = vsel %vm1631_vm2, %v1630_v52, %v1623_v58  ;;  %v1551_v0 = vand.u32 15, %v1513_v53 }
 0x2b3   :  { %v1362_v3 = vmul.f32 %v2570_v1, %v97_v8  ;;  %2137 = vrcp.f32 %v1368_v57  ;;  %v1515_v51 = vadd.s32 48, %v2605_v49  ;;  %v1754_v9 = vsub.f32 %v2498_v31, %v1364_v54 }
 0x2b4   :  { %vm2634_vm5 = vcmp.eq.s32.totalorder %v1551_v0, 0  ;;  %v1758_v53 = vsub.f32 %v2505_v34, %v1368_v57  ;;  %vm1860_vm8 = vcmp.eq.s32.totalorder %v2610_v55, 1  ;;  %vm1864_vm9 = vcmp.eq.s32.totalorder %v2610_v55, 2 }
 0x2bb   :  { %v2136_v2 = vpop.eup %2135 }
 0x2bd   :  { %v2138_v8 = vpop.eup %2137 }
 0x2be   :  { %v1798_v0 = vmul.f32 %v2138_v8, %v1758_v53 }
 0x2c3   :  { %v1683_v14 = vpop.permute.xlu1 %1682 }
 0x2c4   :  { %v1698_v15 = vsel %vm1657_vm1, %v1683_v14, %v2498_v31  ;;  %v1640_v14 = vsel %vm2616_vm3, 0.0, %v1639_v61 }
 0x2c5   :  { %1714 = vrot.lane.b32.xlu1 %v1698_v15, %s2252_s8 }
 0x2c7   :  { %v1685_v6 = vpop.permute.xlu0 %1684 }
 0x2c8   :  { %v1699_v22 = vsel %vm1657_vm1, %v1685_v6, %v2503_v33  ;;  %v1627_v6 = vrot.slane %v2505_v34, 7 }
 0x2cb   :  { %v1691_v16 = vpop.permute.xlu1 %1690 }
 0x2cc   :  { %v1702_v18 = vsel %vm1657_vm1, %v1691_v16, %v2505_v34  ;;  %v1537_v16 = vand.u32 15, %v1511_v59 }
 0x2cd   :  { %1722 = vrot.lane.b32.xlu1 %v1702_v18, %s2252_s8  ;;  %v1625_v18 = vrot.slane %v2519_v37, 7 }
 0x2ce   :  { %vm2652_vm6 = vcmp.eq.s32.totalorder %v1537_v16, 0 }
 0x2cf   :  { %v1693_v19 = vpop.permute.xlu0 %1692 }
 0x2d0   :  { %v1703_v63 = vsel %vm1657_vm1, %v1693_v19, %v2509_v35  ;;  %v1366_v19 = vadd.f32 1e-08, %v1358_v43  ;;  %v1794_v43 = vmul.f32 %v2136_v2, %v1754_v9 }
 0x2d2   :  { %2139 = vrcp.f32 %v1366_v19 }
 0x2d3   :  { %v1695_v20 = vpop.permute.xlu0 %1694  ;;  %v1687_v24 = vpop.permute.xlu1 %1686 }
 0x2d4   :  { %v1704_v25 = vsel %vm1657_vm1, %v1695_v20, %v2513_v36  ;;  %v1700_v26 = vsel %vm1657_vm1, %v1687_v24, %v2519_v37  ;;  %v1624_v24 = vrot.slane %v2503_v33, 7 }
 0x2d5   :  { %1726 = vrot.lane.b32.xlu0 %v1704_v25, %s2252_s8  ;;  %1718 = vrot.lane.b32.xlu1 %v1700_v26, %s2252_s8  ;;  %v2639_v25 = vadd.f32 1e-08, %v1362_v3 }
 0x2d6   :  { %v1637_v32 = vsel %vm1631_vm2, %v1624_v24, %v1625_v18  ;;  %v1638_v42 = vsel %vm1631_vm2, %v1623_v58, %v1624_v24 }
 0x2d7   :  { %v1689_v27 = vpop.permute.xlu1 %1688  ;;  %v1697_v29 = vpop.permute.xlu0 %1696  ;;  %2141 = vrcp.f32 %v2639_v25  ;;  %v1642_v48 = vsel %vm2652_vm6, 0.0, %v1637_v32 }
 0x2d8   :  { %v1701_v28 = vsel %vm1657_vm1, %v1689_v27, %v2527_v39  ;;  %v1705_v23 = vsel %vm1657_vm1, %v1697_v29, %v2521_v38  ;;  %v1565_v29 = vand.u32 15, %v1515_v51  ;;  %v1650_v59 = vsub.f32 %v2519_v37, %v1642_v48 }
 0x2d9   :  { %1716 = vrot.lane.b32.xlu0 %v1699_v22, %s2252_s8  ;;  %1720 = vrot.lane.b32.xlu1 %v1701_v28, %s2252_s8  ;;  %v1628_v22 = vrot.slane %v2509_v35, 7  ;;  %v98_v28 = vld [vmem:[%s2770_s6 + $0x8] sm:$0xff] }
 0x2da   :  { %v1357_v44 = vmul.f32 %v2555_v40, %v98_v28  ;;  %v1359_v46 = vmul.f32 %v2559_v50, %v98_v28  ;;  %vm2667_vm7 = vcmp.eq.s32.totalorder %v1565_v29, 0  ;;  %v1361_v10 = vmul.f32 %v2565_v56, %v98_v28 }
 0x2db   :  { %v1634_v45 = vsel %vm1631_vm2, %v1627_v6, %v1628_v22  ;;  %v1649_v50 = vsub.f32 %v2503_v33, %v1638_v42  ;;  %v1363_v61 = vmul.f32 %v2568_v62, %v98_v28 }
 0x2dc   :  { %v1653_v21 = vsub.f32 %v2509_v35, %v1634_v45  ;;  %v2684_v56 = vadd.f32 1e-08, %v1357_v44  ;;  %v2689_v60 = vadd.f32 1e-08, %v1359_v46  ;;  %v2694_v54 = vadd.f32 1e-08, %v1361_v10  ;;  %v2140_v16 = vpop.eup %2139 }
 0x2dd   :  { %1724 = vrot.lane.b32.xlu0 %v1703_v63, %s2252_s8  ;;  %v1648_v63 = vsub.f32 %v2498_v31, %v1640_v14  ;;  %v2706_v20 = vadd.f32 1e-08, %v1363_v61  ;;  %v1818_v44 = vmul.f32 %v1754_v9, %v1754_v9 }
 0x2de   :  { %v2698_v57 = vmul.f32 %v1653_v21, %v1653_v21  ;;  %2143 = vrcp.f32 %v2684_v56 }
 0x2df   :  { %v1762_v47 = vmul.f32 %v1648_v63, %v1648_v63  ;;  %2145 = vrcp.f32 %v2689_v60 }
 0x2e0   :  { %2147 = vrcp.f32 %v2694_v54 }
 0x2e1   :  { %1728 = vrot.lane.b32.xlu0 %v1705_v23, %s2252_s8  ;;  %v1629_v23 = vrot.slane %v2513_v36, 7  ;;  %2149 = vrcp.f32 %v2706_v20 }
 0x2fd   :  { %115 = vadd.xlane.f32.xlu1 %v114_v11  ;;  %v1633_v11 = vsel %vm1631_vm2, %v1628_v22, %v1629_v23  ;;  %v1806_v22 = vand.u32 2147483647, %v1798_v0 }
 0x300   :  { %985 = vadd.xlane.f32.xlu0 %v984_v5  ;;  %v1626_v5 = vrot.slane %v2527_v39, 7 }
 0x302   :  { %v1635_v27 = vsel %vm1631_vm2, %v1626_v5, %v1627_v6  ;;  %v1764_v6 = vmul.f32 %v1650_v59, %v1650_v59  ;;  %v1636_v62 = vsel %vm1631_vm2, %v1625_v18, %v1626_v5  ;;  %v1760_v5 = vsub.f32 %v2513_v36, %v2639_v25 }
 0x303   :  { %v1644_v41 = vsel %vm2634_vm5, 0.0, %v1635_v27  ;;  %v1756_v27 = vsub.f32 %v2519_v37, %v1366_v19 }
 0x304   :  { %v1652_v40 = vsub.f32 %v2505_v34, %v1644_v41  ;;  %v1824_v49 = vmul.f32 %v1760_v5, %v1760_v5 }
 0x305   :  { %v1796_v45 = vmul.f32 %v2140_v16, %v1756_v27 }
 0x306   :  { %v1766_v3 = vmul.f32 %v1652_v40, %v1652_v40 }
 0x337   :  { %v1715_v15 = vpop.permute.xlu1 %1714 }
 0x338   :  { %v1738_v1 = vsel %vm1656_vm4, 0.0, %v1715_v15  ;;  %v2696_v15 = vmul.f32 %v1649_v50, %v1649_v50 }
 0x339   :  { %v1746_v26 = vsub.f32 %v2498_v31, %v1738_v1  ;;  %v1646_v31 = vsel %vm2667_vm7, 0.0, %v1633_v11  ;;  %v1802_v1 = vand.u32 2147483647, %v1794_v43  ;;  %v1651_v11 = vsub.f32 %v2527_v39, %v1636_v62 }
 0x33a   :  { %v1654_v24 = vsub.f32 %v2513_v36, %v1646_v31 }
 0x33b   :  { %v1770_v4 = vmul.f32 %v1746_v26, %v1746_v26  ;;  %v2142_v26 = vpop.eup %2141 }
 0x33c   :  { %v1800_v46 = vmul.f32 %v2142_v26, %v1760_v5  ;;  %v1768_v25 = vmul.f32 %v1654_v24, %v1654_v24  ;;  %v2144_v59 = vpop.eup %2143  ;;  %v1759_v24 = vsub.f32 %v2509_v35, %v2694_v54 }
 0x33d   :  { %v1778_v12 = vadd.f32 %v1770_v4, %v1762_v47  ;;  %v1822_v4 = vmul.f32 %v1758_v53, %v1758_v53  ;;  %v1632_v53 = vsel %vm1631_vm2, %v1629_v23, %v1630_v52 }
 0x33e   :  { %v1808_v21 = vand.u32 2147483647, %v1800_v46 }
 0x33f   :  { %v1723_v7 = vpop.permute.xlu1 %1722  ;;  %v1786_v14 = vsub.f32 0.0, %v1778_v12 }
 0x340   :  { %v1742_v13 = vsel %vm1656_vm4, 0.0, %v1723_v7 }
 0x341   :  { %v1750_v58 = vsub.f32 %v2505_v34, %v1742_v13  ;;  %v1810_v18 = vsub.f32 %v1786_v14, %v1802_v1  ;;  %v1804_v13 = vand.u32 2147483647, %v1796_v45  ;;  %v1755_v14 = vsub.f32 %v2503_v33, %v2684_v56 }
 0x343   :  { %v1774_v51 = vmul.f32 %v1750_v58, %v1750_v58  ;;  %v1826_v40 = vsub.f32 %v1810_v18, %v1818_v44  ;;  %v1795_v1 = vmul.f32 %v2144_v59, %v1755_v14 }
 0x345   :  { %v1782_v34 = vadd.f32 %v1774_v51, %v1766_v3  ;;  %v2146_v51 = vpop.eup %2145 }
 0x346   :  { %v2148_v62 = vpop.eup %2147 }
 0x347   :  { %v1790_v28 = vsub.f32 0.0, %v1782_v34  ;;  %v1727_v63 = vpop.permute.xlu0 %1726  ;;  %v1719_v29 = vpop.permute.xlu1 %1718  ;;  %v1820_v34 = vmul.f32 %v1756_v27, %v1756_v27  ;;  %v1799_v5 = vmul.f32 %v2148_v62, %v1759_v24 }
 0x348   :  { %v1744_v30 = vsel %vm1656_vm4, 0.0, %v1727_v63  ;;  %v1740_v32 = vsel %vm1656_vm4, 0.0, %v1719_v29  ;;  %v2150_v29 = vpop.eup %2149 }
 0x349   :  { %v1814_v41 = vsub.f32 %v1790_v28, %v1806_v22  ;;  %v1752_v19 = vsub.f32 %v2513_v36, %v1744_v30  ;;  %v1748_v42 = vsub.f32 %v2519_v37, %v1740_v32  ;;  %v1655_v22 = vsub.f32 %v2521_v38, %v1632_v53 }
 0x34a   :  { %v1807_v45 = vand.u32 2147483647, %v1799_v5 }
 0x34b   :  { %v1830_v47 = vsub.f32 %v1814_v41, %v1822_v4  ;;  %v1776_v17 = vmul.f32 %v1752_v19, %v1752_v19  ;;  %v1772_v48 = vmul.f32 %v1748_v42, %v1748_v42  ;;  %v1717_v2 = vpop.permute.xlu0 %1716  ;;  %v1721_v10 = vpop.permute.xlu1 %1720  ;;  %v1803_v41 = vand.u32 2147483647, %v1795_v1 }
 0x34c   :  { %v1739_v7 = vsel %vm1656_vm4, 0.0, %v1717_v2  ;;  %v1741_v37 = vsel %vm1656_vm4, 0.0, %v1721_v10  ;;  %v1769_v42 = vmul.f32 %v1655_v22, %v1655_v22  ;;  %v1823_v2 = vmul.f32 %v1759_v24, %v1759_v24 }
 0x34d   :  { %v1784_v50 = vadd.f32 %v1776_v17, %v1768_v25  ;;  %v1780_v8 = vadd.f32 %v1772_v48, %v1764_v6  ;;  %v1747_v9 = vsub.f32 %v2503_v33, %v1739_v7  ;;  %v1749_v12 = vsub.f32 %v2527_v39, %v1741_v37 }
 0x34e   :  { %v2733_v58 = vsub.f32 %v1826_v40, %v1830_v47  ;;  %v1765_v6 = vmul.f32 %v1651_v11, %v1651_v11  ;;  %v1757_v33 = vsub.f32 %v2527_v39, %v2689_v60  ;;  %v1819_v48 = vmul.f32 %v1755_v14, %v1755_v14 }
 0x34f   :  { %v1792_v43 = vsub.f32 0.0, %v1784_v50  ;;  %v1788_v61 = vsub.f32 0.0, %v1780_v8  ;;  %v1771_v31 = vmul.f32 %v1747_v9, %v1747_v9  ;;  %v1773_v0 = vmul.f32 %v1749_v12, %v1749_v12  ;;  %v1725_v3 = vpop.permute.xlu0 %1724 }
 0x350   :  { %v1743_v36 = vsel %vm1656_vm4, 0.0, %v1725_v3  ;;  %v1797_v32 = vmul.f32 %v2146_v51, %v1757_v33  ;;  %v1821_v37 = vmul.f32 %v1757_v33, %v1757_v33  ;;  %v1838_v9 = vand.u32 2147483647, %v2733_v58 }
 0x351   :  { %v1816_v52 = vsub.f32 %v1792_v43, %v1808_v21  ;;  %v1812_v23 = vsub.f32 %v1788_v61, %v1804_v13  ;;  %v1779_v16 = vadd.f32 %v1771_v31, %v2696_v15  ;;  %v1751_v26 = vsub.f32 %v2509_v35, %v1743_v36 }
 0x352   :  { %v1781_v28 = vadd.f32 %v1773_v0, %v1765_v6  ;;  %v1761_v35 = vsub.f32 %v2521_v38, %v2706_v20  ;;  %v1805_v25 = vand.u32 2147483647, %v1797_v32  ;;  %v1842_v43 = vsel %vm107_vm0, %v1838_v9, 0.0 }
 0x353   :  { %v1832_v56 = vsub.f32 %v1816_v52, %v1824_v49  ;;  %v1828_v27 = vsub.f32 %v1812_v23, %v1820_v34  ;;  %v1729_v63 = vpop.permute.xlu0 %1728  ;;  %v1787_v18 = vsub.f32 0.0, %v1779_v16  ;;  %v1775_v30 = vmul.f32 %v1751_v26, %v1751_v26 }
 0x354   :  { %v1745_v15 = vsel %vm1656_vm4, 0.0, %v1729_v63  ;;  %v1801_v60 = vmul.f32 %v2150_v29, %v1761_v35  ;;  %v1789_v19 = vsub.f32 0.0, %v1781_v28  ;;  %v1825_v50 = vmul.f32 %v1761_v35, %v1761_v35 }
 0x355   :  { %v1753_v54 = vsub.f32 %v2521_v38, %v1745_v15  ;;  %v1836_v4 = vsub.f32 %v1828_v27, %v1832_v56  ;;  %v1783_v39 = vadd.f32 %v1775_v30, %v2698_v57  ;;  %v1811_v46 = vsub.f32 %v1787_v18, %v1803_v41 }
 0x356   :  { %v1809_v40 = vand.u32 2147483647, %v1801_v60  ;;  %v1813_v20 = vsub.f32 %v1789_v19, %v1805_v25 }
 0x357   :  { %v1777_v44 = vmul.f32 %v1753_v54, %v1753_v54  ;;  %v1791_v47 = vsub.f32 0.0, %v1783_v39  ;;  %v1827_v38 = vsub.f32 %v1811_v46, %v1819_v48  ;;  %v1840_v53 = vand.u32 2147483647, %v1836_v4 }
 0x358   :  { %v1829_v12 = vsub.f32 %v1813_v20, %v1821_v37 }
 0x359   :  { %v1785_v17 = vadd.f32 %v1777_v44, %v1769_v42  ;;  %v1815_v10 = vsub.f32 %v1791_v47, %v1807_v45  ;;  %v1845_v3 = vsel %vm107_vm0, %v1840_v53, 0.0 }
 0x35b   :  { %v1793_v7 = vsub.f32 0.0, %v1785_v17  ;;  %v1831_v11 = vsub.f32 %v1815_v10, %v1823_v2 }
 0x35d   :  { %v1817_v57 = vsub.f32 %v1793_v7, %v1809_v40  ;;  %v1835_v8 = vsub.f32 %v1827_v38, %v1831_v11 }
 0x35f   :  { %v1833_v13 = vsub.f32 %v1817_v57, %v1825_v50  ;;  %v1839_v21 = vand.u32 2147483647, %v1835_v8 }
 0x361   :  { %v1837_v59 = vsub.f32 %v1829_v12, %v1833_v13  ;;  %v1843_v61 = vsel %vm107_vm0, %v1839_v21, 0.0 }
 0x362   :  { %v1844_v0 = vadd.f32 %v1843_v61, %v1842_v43 }
 0x363   :  { %v1841_v31 = vand.u32 2147483647, %v1837_v59 }
 0x364   :  { %v1846_v51 = vadd.f32 %v1845_v3, %v1844_v0 }
 0x365   :  { %v1847_v14 = vsel %vm107_vm0, %v1841_v31, 0.0 }
 0x366   :  { %v1848_v34 = vadd.f32 %v1847_v14, %v1846_v51 }
 0x368   :  { %1849 = vadd.xlane.f32.xlu0 %v1848_v34 }
 0x38a   :  { %v116_v6 = vpop.xlane.xlu1 %115 }
 0x38b   :  { %v117_v58 = vrot.slane %v116_v6, 4 }
 0x38d   :  { %v986_v36 = vpop.xlane.xlu0 %985  ;;  %v118_v62 = vadd.f32 %v117_v58, %v116_v6 }
 0x38e   :  { %v987_v49 = vrot.slane %v986_v36, 4 }
 0x38f   :  { %v119_v52 = vrot.slane %v118_v62, 2 }
 0x390   :  { %v988_v23 = vadd.f32 %v987_v49, %v986_v36 }
 0x391   :  { %v120_v16 = vadd.f32 %v119_v52, %v118_v62 }
 0x392   :  { %v989_v1 = vrot.slane %v988_v23, 2 }
 0x393   :  { %v121_v24 = vrot.slane %v120_v16, 1 }
 0x394   :  { %v990_v26 = vadd.f32 %v989_v1, %v988_v23 }
 0x395   :  { %v122_v22 = vadd.f32 %v121_v24, %v120_v16 }
 0x396   :  { %v991_v33 = vrot.slane %v990_v26, 1 }
 0x397   :  { %2112 = vpush %v122_v22 }
 0x398   :  { %v992_v56 = vadd.f32 %v991_v33, %v990_v26 }
 0x39a   :  { %2114 = vpush %v992_v56 }
 0x3c8   :  { %s2113_s6 = spop %2112 }
 0x3c9   :  { %v1861_v15 = vstv %s2113_s6 }
 0x3ca   :  { %v1862_v35 = vsel %vm1860_vm8, %v1861_v15, 0.0 }
 0x3cb   :  { %s2115_s15 = spop %2114 }
 0x3cc   :  { %v1858_v32 = vstv %s2115_s15 }
 0x3cd   :  { %v1859_v54 = vsel %vm1656_vm4, %v1858_v32, 0.0 }
 0x3ce   :  { %v1863_v4 = vadd.f32 %v1862_v35, %v1859_v54 }
 0x3f5   :  { %v1850_v27 = vpop.xlane.xlu0 %1849 }
 0x3f6   :  { %v1851_v28 = vrot.slane %v1850_v27, 4 }
 0x3f8   :  { %v1852_v63 = vadd.f32 %v1851_v28, %v1850_v27 }
 0x3fa   :  { %v1853_v29 = vrot.slane %v1852_v63, 2 }
 0x3fc   :  { %v1854_v5 = vadd.f32 %v1853_v29, %v1852_v63 }
 0x3fe   :  { %v1855_v18 = vrot.slane %v1854_v5, 1 }
 0x400   :  { %v1856_v30 = vadd.f32 %v1855_v18, %v1854_v5 }
 0x402   :  { %2116 = vpush %v1856_v30 }
 0x433   :  { %s2117_s16 = spop %2116 }
 0x434   :  { %v1865_v41 = vstv %s2117_s16 }
 0x435   :  { %v1866_v39 = vsel %vm1864_vm9, %v1865_v41, 0.0 }
 0x436   :  { %v1867_v60 = vadd.f32 %v1866_v39, %v1863_v4 }
 0x438   :  { %1868 = vst [vmem:[%s2771_s7] sm:$0x1] %v1867_v60 }
 0x439   :  { %1873 = vsyncpa [#allocation3], 1 }
 0x43a   :  { %1874 = vsyncpa [#allocation5], 1 }
 0x43b   :  { %1875 = vsyncpa [#allocation8], 1 }

</bundles_post_ra>
